<compile_context>
chip_gen: v5e
topology: v5e:2x2
jax: 0.10.0
libtpu: 0.0.40
codegen_flags: <defaults>
</compile_context>

<pallas_src>
import functools

import jax
import jax.numpy as jnp
from jax.experimental import pallas as pl
from jax.experimental.pallas import tpu as pltpu


def _stacked_attention_kernel(C, x_ref, w1_ref, bn1_s_ref, bn1_b_ref,
                              w2_ref, bn2_s_ref, bn2_b_ref,
                              qv_w_ref, v_b_ref,
                              tr_w_ref, tr_b_ref, sbn_s_ref, sbn_b_ref,
                              out_ref):
    f32 = jnp.float32
    bf16 = jnp.bfloat16
    x = x_ref[0]                                                     # (N, C) bf16

    # backbone: x = relu(bn2(conv2(relu(bn1(conv1(x))))))
    h = jnp.dot(x, w1_ref[...], preferred_element_type=f32)
    h = jnp.maximum(h * bn1_s_ref[...] + bn1_b_ref[...], 0.0)
    h = jnp.dot(h.astype(bf16), w2_ref[...], preferred_element_type=f32)
    h = jnp.maximum(h * bn2_s_ref[...] + bn2_b_ref[...], 0.0)

    cur = h                                                          # f32 residual stream
    for i in range(4):  # four SA_Layers, statically unrolled
        cur_b = cur.astype(bf16)
        # fused v/q projection: one matmul, outputs [v (C) | q (C//4)]
        qv = jnp.dot(cur_b, qv_w_ref[i], preferred_element_type=f32)  # (N, C + C//4)
        v = qv[:, :C] + v_b_ref[i]                                    # (N, C)
        q = qv[:, C:]                                                 # (N, C//4); k == q (tied weights)

        # energy[n, m] = sum_d q[n, d] * q[m, d]   (== x_q @ x_k in torch)
        qb = q.astype(bf16)
        energy = jax.lax.dot_general(qb, qb, (((1,), (1,)), ((), ())),
                                     preferred_element_type=f32)      # (N, N)
        energy = energy - jnp.max(energy, axis=-1, keepdims=True)
        p = jnp.exp(energy)
        # softmax(dim=-1): multiply by 1/rowsum (EUP reciprocal, no N^2 divide)
        inv_row = pl.reciprocal(jnp.sum(p, axis=-1, keepdims=True), approx=True)  # (N, 1)
        p = p * inv_row
        # second normalization (torch sum(dim=1)): per-column 1/(1e-9 + colsum)
        inv_col = pl.reciprocal(1e-9 + jnp.sum(p, axis=0, keepdims=True),
                                approx=True)                           # (1, N)
        p = p * inv_col
        # x_r[m, c] = sum_n p[n, m] * v[n, c]   (== x_v @ attention in torch)
        x_r = jax.lax.dot_general(p.astype(bf16), v.astype(bf16),
                                  (((0,), (0,)), ((), ())),
                                  preferred_element_type=f32)          # (N, C)

        t = jnp.dot((cur - x_r).astype(bf16), tr_w_ref[i],
                    preferred_element_type=f32) + tr_b_ref[i]
        t = jnp.maximum(t * sbn_s_ref[i] + sbn_b_ref[i], 0.0)          # relu(after_norm(...))
        cur = cur + t
        out_ref[0, i] = cur                                            # direct store, lane-0 aligned


def stacked_attention_pallas(x_bcn, p):
    """x_bcn: (B, C, N) float32 (PyTorch layout).  Returns (B, 4*C, N) float32."""
    B, C, N = x_bcn.shape
    C4 = C // 4
    bf16 = jnp.bfloat16
    x_bnc = jnp.transpose(x_bcn, (0, 2, 1)).astype(bf16)              # kernel layout, bf16 DMA
    # NOTE(perf): callers that can consume channels-last may take the raw (B, 4, N, C)
    # kernel output and skip the transposes around this wrapper entirely.

    # pre-transpose weights to (C_in, C_out), cast matmul weights to bf16,
    # fuse v/q projection weights ([v | q] order), keep BN/bias vectors f32.
    qv_w = jnp.concatenate(
        [jnp.transpose(p["v_w"], (0, 2, 1)),                          # (4, C, C)
         jnp.transpose(p["qk_w"], (0, 2, 1))], axis=-1).astype(bf16)   # (4, C, C + C4)
    args = (
        x_bnc,
        p["w1"].T.astype(bf16), p["bn1_scale"][None, :], p["bn1_shift"][None, :],
        p["w2"].T.astype(bf16), p["bn2_scale"][None, :], p["bn2_shift"][None, :],
        qv_w,
        p["v_b"][:, None, :],                                          # (4, 1, C)
        jnp.transpose(p["tr_w"], (0, 2, 1)).astype(bf16),              # (4, C, C)
        p["tr_b"][:, None, :],                                         # (4, 1, C)
        p["sbn_scale"][:, None, :], p["sbn_shift"][:, None, :],        # (4, 1, C)
    )

    def full_spec(shape):
        nd = len(shape)
        return pl.BlockSpec(shape, lambda b, _nd=nd: (0,) * _nd)

    in_specs = [pl.BlockSpec((1, N, C), lambda b: (b, 0, 0))] + \
               [full_spec(a.shape) for a in args[1:]]

    out_b4nc = pl.pallas_call(
        functools.partial(_stacked_attention_kernel, C),
        out_shape=jax.ShapeDtypeStruct((B, 4, N, C), jnp.float32),
        grid=(B,),
        in_specs=in_specs,
        out_specs=pl.BlockSpec((1, 4, N, C), lambda b: (b, 0, 0, 0)),
        compiler_params=pltpu.CompilerParams(
            dimension_semantics=("parallel",),
            vmem_limit_bytes=48 * 1024 * 1024,
        ),
    )(*args)
    # (B, 4, N, C) -> (B, 4, C, N) -> (B, 4*C, N): matches torch.cat((x1..x4), dim=1)
    return jnp.transpose(out_b4nc, (0, 1, 3, 2)).reshape(B, 4 * C, N)


# ---------------------------------------------------------------------------
# pure-JAX f32 reference in PyTorch layout (for correctness check only)
# ---------------------------------------------------------------------------
def ref_stacked_attention(x, p):
    def conv(w, x, b=None):                                           # w: (Cout, Cin)
        y = jnp.einsum("oc,bcn->bon", w, x)
        return y if b is None else y + b[None, :, None]

    def bn(scale, shift, x):
        return x * scale[None, :, None] + shift[None, :, None]

    relu = lambda z: jnp.maximum(z, 0.0)

    h = relu(bn(p["bn1_scale"], p["bn1_shift"], conv(p["w1"], x)))
    h = relu(bn(p["bn2_scale"], p["bn2_shift"], conv(p["w2"], h)))
    outs, cur = [], h
    for i in range(4):
        q = conv(p["qk_w"][i], cur)                                   # (B, C4, N)
        x_q = jnp.transpose(q, (0, 2, 1))
        x_k = q
        x_v = conv(p["v_w"][i], cur, p["v_b"][i])
        energy = jnp.einsum("bnd,bdm->bnm", x_q, x_k)
        attn = jax.nn.softmax(energy, axis=-1)
        attn = attn / (1e-9 + jnp.sum(attn, axis=1, keepdims=True))
        x_r = jnp.einsum("bcn,bnm->bcm", x_v, attn)
        t = conv(p["tr_w"][i], cur - x_r, p["tr_b"][i])
        t = relu(bn(p["sbn_scale"][i], p["sbn_shift"][i], t))
        cur = cur + t
        outs.append(cur)
    return jnp.concatenate(outs, axis=1)


def make_params(key, C):
    C4 = C // 4
    ks = list(jax.random.split(key, 24))

    def w(k, shape, fan_in):
        return (jax.random.normal(k, shape, jnp.float32) / jnp.sqrt(fan_in)).astype(jnp.float32)

    def bn_affine(k):
        k1, k2, k3, k4 = jax.random.split(k, 4)
        gamma = jax.random.uniform(k1, (C,), jnp.float32, 0.5, 1.5)
        beta = 0.1 * jax.random.normal(k2, (C,), jnp.float32)
        mean = 0.1 * jax.random.normal(k3, (C,), jnp.float32)
        var = jax.random.uniform(k4, (C,), jnp.float32, 0.5, 1.5)
        scale = gamma / jnp.sqrt(var + 1e-5)
        return scale, beta - mean * scale

    bn1_s, bn1_b = bn_affine(ks[2])
    bn2_s, bn2_b = bn_affine(ks[3])
    sbn = [bn_affine(ks[4 + i]) for i in range(4)]
    return {
        "w1": w(ks[0], (C, C), C),
        "w2": w(ks[1], (C, C), C),
        "bn1_scale": bn1_s, "bn1_shift": bn1_b,
        "bn2_scale": bn2_s, "bn2_shift": bn2_b,
        "qk_w": w(ks[8], (4, C4, C), C),
        "v_w": w(ks[9], (4, C, C), C),
        "v_b": 0.1 * jax.random.normal(ks[10], (4, C), jnp.float32),
        "tr_w": w(ks[11], (4, C, C), C),
        "tr_b": 0.1 * jax.random.normal(ks[12], (4, C), jnp.float32),
        "sbn_scale": jnp.stack([s for s, _ in sbn]),
        "sbn_shift": jnp.stack([b for _, b in sbn]),
    }


if __name__ == "__main__":
    B, C, N = 2, 32, 16
    key = jax.random.PRNGKey(0)
    kx, kp = jax.random.split(key)
    x = jax.random.normal(kx, (B, C, N), jnp.float32)
    params = make_params(kp, C)

    out = stacked_attention_pallas(x, params)
    out = jax.block_until_ready(out)

    ref = jax.block_until_ready(ref_stacked_attention(x, params))
    assert out.shape == (B, 4 * C, N), out.shape
    # bf16 MXU operands + approximate EUP reciprocals => loosened tolerance vs the
    # f32 reference; a real bug would blow far past these.
    max_err = float(jnp.max(jnp.abs(out - ref)))
    rel_err = float(jnp.sqrt(jnp.sum((out - ref) ** 2)) /
                    (jnp.sqrt(jnp.sum(ref ** 2)) + 1e-12))
    assert rel_err < 5e-2 and max_err < 0.5, (rel_err, max_err)
    print("KERNEL_OK")
</pallas_src>

<mosaic_0001>
module attributes {stable_mosaic.version = 11 : i64} {
  func.func @_stacked_attention_kernel(%arg0: i32, %arg1: memref<1x16x32xbf16, #tpu.memory_space<vmem>>, %arg2: memref<32x32xbf16, #tpu.memory_space<vmem>>, %arg3: memref<1x32xf32, #tpu.memory_space<vmem>>, %arg4: memref<1x32xf32, #tpu.memory_space<vmem>>, %arg5: memref<32x32xbf16, #tpu.memory_space<vmem>>, %arg6: memref<1x32xf32, #tpu.memory_space<vmem>>, %arg7: memref<1x32xf32, #tpu.memory_space<vmem>>, %arg8: memref<4x32x40xbf16, #tpu.memory_space<vmem>>, %arg9: memref<4x1x32xf32, #tpu.memory_space<vmem>>, %arg10: memref<4x32x32xbf16, #tpu.memory_space<vmem>>, %arg11: memref<4x1x32xf32, #tpu.memory_space<vmem>>, %arg12: memref<4x1x32xf32, #tpu.memory_space<vmem>>, %arg13: memref<4x1x32xf32, #tpu.memory_space<vmem>>, %arg14: memref<1x4x16x32xf32, #tpu.memory_space<vmem>>) attributes {dimension_semantics = [#tpu.dimension_semantics<parallel>], iteration_bounds = array<i64: 2>, scalar_prefetch = 0 : i64, scratch_operands = 0 : i64, tpu.core_type = #tpu.core_type<tc>, window_params = [{transform_indices = @transform_0, window_bounds = array<i64: 1, 16, 32>}, {pipeline_mode = #tpu.pipeline_mode<synchronous>, transform_indices = @transform_1, window_bounds = array<i64: 32, 32>}, {pipeline_mode = #tpu.pipeline_mode<synchronous>, transform_indices = @transform_2, window_bounds = array<i64: 1, 32>}, {pipeline_mode = #tpu.pipeline_mode<synchronous>, transform_indices = @transform_3, window_bounds = array<i64: 1, 32>}, {pipeline_mode = #tpu.pipeline_mode<synchronous>, transform_indices = @transform_4, window_bounds = array<i64: 32, 32>}, {pipeline_mode = #tpu.pipeline_mode<synchronous>, transform_indices = @transform_5, window_bounds = array<i64: 1, 32>}, {pipeline_mode = #tpu.pipeline_mode<synchronous>, transform_indices = @transform_6, window_bounds = array<i64: 1, 32>}, {pipeline_mode = #tpu.pipeline_mode<synchronous>, transform_indices = @transform_7, window_bounds = array<i64: 4, 32, 40>}, {pipeline_mode = #tpu.pipeline_mode<synchronous>, transform_indices = @transform_8, window_bounds = array<i64: 4, 1, 32>}, {pipeline_mode = #tpu.pipeline_mode<synchronous>, transform_indices = @transform_9, window_bounds = array<i64: 4, 32, 32>}, {pipeline_mode = #tpu.pipeline_mode<synchronous>, transform_indices = @transform_10, window_bounds = array<i64: 4, 1, 32>}, {pipeline_mode = #tpu.pipeline_mode<synchronous>, transform_indices = @transform_11, window_bounds = array<i64: 4, 1, 32>}, {pipeline_mode = #tpu.pipeline_mode<synchronous>, transform_indices = @transform_12, window_bounds = array<i64: 4, 1, 32>}, {transform_indices = @transform_13, window_bounds = array<i64: 1, 4, 16, 32>}]} {
    %c0 = arith.constant 0 : index
    %c0_0 = arith.constant 0 : index
    %c0_1 = arith.constant 0 : index
    %0 = vector.load %arg1[%c0, %c0_0, %c0_1] : memref<1x16x32xbf16, #tpu.memory_space<vmem>>, vector<1x16x32xbf16>
    %1 = vector.shape_cast %0 : vector<1x16x32xbf16> to vector<16x32xbf16>
    %c0_2 = arith.constant 0 : index
    %c0_3 = arith.constant 0 : index
    %2 = vector.load %arg2[%c0_2, %c0_3] : memref<32x32xbf16, #tpu.memory_space<vmem>>, vector<32x32xbf16>
    %cst = arith.constant dense<0.000000e+00> : vector<16x32xf32>
    %3 = tpu.matmul %1, %2, %cst {dimension_numbers = #tpu.dot_dimension_numbers<[1], [0], [0], [1], [0, 0, 1, 1], [], []>} : vector<16x32xbf16>, vector<32x32xbf16>, vector<16x32xf32> -> vector<16x32xf32>
    %c0_4 = arith.constant 0 : index
    %c0_5 = arith.constant 0 : index
    %4 = vector.load %arg3[%c0_4, %c0_5] : memref<1x32xf32, #tpu.memory_space<vmem>>, vector<1x32xf32>
    %5 = vector.broadcast %4 : vector<1x32xf32> to vector<16x32xf32>
    %6 = arith.mulf %3, %5 : vector<16x32xf32>
    %c0_6 = arith.constant 0 : index
    %c0_7 = arith.constant 0 : index
    %7 = vector.load %arg4[%c0_6, %c0_7] : memref<1x32xf32, #tpu.memory_space<vmem>>, vector<1x32xf32>
    %8 = vector.broadcast %7 : vector<1x32xf32> to vector<16x32xf32>
    %9 = arith.addf %6, %8 : vector<16x32xf32>
    %cst_8 = arith.constant 0.000000e+00 : f32
    %10 = vector.broadcast %cst_8 : f32 to vector<16x32xf32>
    %11 = arith.maximumf %9, %10 : vector<16x32xf32>
    %12 = arith.truncf %11 : vector<16x32xf32> to vector<16x32xbf16>
    %c0_9 = arith.constant 0 : index
    %c0_10 = arith.constant 0 : index
    %13 = vector.load %arg5[%c0_9, %c0_10] : memref<32x32xbf16, #tpu.memory_space<vmem>>, vector<32x32xbf16>
    %cst_11 = arith.constant dense<0.000000e+00> : vector<16x32xf32>
    %14 = tpu.matmul %12, %13, %cst_11 {dimension_numbers = #tpu.dot_dimension_numbers<[1], [0], [0], [1], [0, 0, 1, 1], [], []>} : vector<16x32xbf16>, vector<32x32xbf16>, vector<16x32xf32> -> vector<16x32xf32>
    %c0_12 = arith.constant 0 : index
    %c0_13 = arith.constant 0 : index
    %15 = vector.load %arg6[%c0_12, %c0_13] : memref<1x32xf32, #tpu.memory_space<vmem>>, vector<1x32xf32>
    %16 = vector.broadcast %15 : vector<1x32xf32> to vector<16x32xf32>
    %17 = arith.mulf %14, %16 : vector<16x32xf32>
    %c0_14 = arith.constant 0 : index
    %c0_15 = arith.constant 0 : index
    %18 = vector.load %arg7[%c0_14, %c0_15] : memref<1x32xf32, #tpu.memory_space<vmem>>, vector<1x32xf32>
    %19 = vector.broadcast %18 : vector<1x32xf32> to vector<16x32xf32>
    %20 = arith.addf %17, %19 : vector<16x32xf32>
    %cst_16 = arith.constant 0.000000e+00 : f32
    %21 = vector.broadcast %cst_16 : f32 to vector<16x32xf32>
    %22 = arith.maximumf %20, %21 : vector<16x32xf32>
    %23 = arith.truncf %22 : vector<16x32xf32> to vector<16x32xbf16>
    %c0_17 = arith.constant 0 : index
    %c0_18 = arith.constant 0 : index
    %c0_19 = arith.constant 0 : index
    %24 = vector.load %arg8[%c0_17, %c0_18, %c0_19] : memref<4x32x40xbf16, #tpu.memory_space<vmem>>, vector<1x32x40xbf16>
    %25 = vector.shape_cast %24 : vector<1x32x40xbf16> to vector<32x40xbf16>
    %cst_20 = arith.constant dense<0.000000e+00> : vector<16x40xf32>
    %26 = tpu.matmul %23, %25, %cst_20 {dimension_numbers = #tpu.dot_dimension_numbers<[1], [0], [0], [1], [0, 0, 1, 1], [], []>} : vector<16x32xbf16>, vector<32x40xbf16>, vector<16x40xf32> -> vector<16x40xf32>
    %27 = vector.extract_strided_slice %26 {offsets = [0, 0], sizes = [16, 32], strides = [1, 1]} : vector<16x40xf32> to vector<16x32xf32>
    %c0_21 = arith.constant 0 : index
    %c0_22 = arith.constant 0 : index
    %c0_23 = arith.constant 0 : index
    %28 = vector.load %arg9[%c0_21, %c0_22, %c0_23] : memref<4x1x32xf32, #tpu.memory_space<vmem>>, vector<1x1x32xf32>
    %29 = vector.shape_cast %28 : vector<1x1x32xf32> to vector<1x32xf32>
    %30 = vector.broadcast %29 : vector<1x32xf32> to vector<16x32xf32>
    %31 = arith.addf %27, %30 : vector<16x32xf32>
    %32 = vector.extract_strided_slice %26 {offsets = [0, 32], sizes = [16, 8], strides = [1, 1]} : vector<16x40xf32> to vector<16x8xf32>
    %33 = arith.truncf %32 : vector<16x8xf32> to vector<16x8xbf16>
    %cst_24 = arith.constant dense<0.000000e+00> : vector<16x16xf32>
    %34 = tpu.matmul %33, %33, %cst_24 {dimension_numbers = #tpu.dot_dimension_numbers<[1], [1], [0], [0], [0, 0, 1, 0], [], []>} : vector<16x8xbf16>, vector<16x8xbf16>, vector<16x16xf32> -> vector<16x16xf32>
    %cst_25 = arith.constant dense<0xFF800000> : vector<16xf32>
    %35 = vector.multi_reduction <maximumf>, %34, %cst_25 [1] : vector<16x16xf32> to vector<16xf32>
    %36 = vector.shape_cast %35 : vector<16xf32> to vector<16x1xf32>
    %37 = vector.broadcast %36 : vector<16x1xf32> to vector<16x16xf32>
    %38 = arith.subf %34, %37 : vector<16x16xf32>
    %39 = math.exp %38 : vector<16x16xf32>
    %cst_26 = arith.constant dense<0.000000e+00> : vector<16xf32>
    %40 = vector.multi_reduction <add>, %39, %cst_26 [1] : vector<16x16xf32> to vector<16xf32>
    %41 = vector.shape_cast %40 : vector<16xf32> to vector<16x1xf32>
    %42 = tpu.reciprocal %41 {approx = true} : vector<16x1xf32> -> vector<16x1xf32>
    %43 = vector.broadcast %42 : vector<16x1xf32> to vector<16x16xf32>
    %44 = arith.mulf %39, %43 : vector<16x16xf32>
    %cst_27 = arith.constant dense<0.000000e+00> : vector<16xf32>
    %45 = vector.multi_reduction <add>, %44, %cst_27 [0] : vector<16x16xf32> to vector<16xf32>
    %46 = vector.shape_cast %45 : vector<16xf32> to vector<1x16xf32>
    %cst_28 = arith.constant 9.99999971E-10 : f32
    %47 = vector.broadcast %cst_28 : f32 to vector<1x16xf32>
    %48 = arith.addf %47, %46 : vector<1x16xf32>
    %49 = tpu.reciprocal %48 {approx = true} : vector<1x16xf32> -> vector<1x16xf32>
    %50 = vector.broadcast %49 : vector<1x16xf32> to vector<16x16xf32>
    %51 = arith.mulf %44, %50 : vector<16x16xf32>
    %52 = arith.truncf %51 : vector<16x16xf32> to vector<16x16xbf16>
    %53 = arith.truncf %31 : vector<16x32xf32> to vector<16x32xbf16>
    %cst_29 = arith.constant dense<0.000000e+00> : vector<16x32xf32>
    %54 = tpu.matmul %52, %53, %cst_29 {dimension_numbers = #tpu.dot_dimension_numbers<[0], [0], [1], [1], [0, 1, 1, 1], [], []>} : vector<16x16xbf16>, vector<16x32xbf16>, vector<16x32xf32> -> vector<16x32xf32>
    %55 = arith.subf %22, %54 : vector<16x32xf32>
    %56 = arith.truncf %55 : vector<16x32xf32> to vector<16x32xbf16>
    %c0_30 = arith.constant 0 : index
    %c0_31 = arith.constant 0 : index
    %c0_32 = arith.constant 0 : index
    %57 = vector.load %arg10[%c0_30, %c0_31, %c0_32] : memref<4x32x32xbf16, #tpu.memory_space<vmem>>, vector<1x32x32xbf16>
    %58 = vector.shape_cast %57 : vector<1x32x32xbf16> to vector<32x32xbf16>
    %cst_33 = arith.constant dense<0.000000e+00> : vector<16x32xf32>
    %59 = tpu.matmul %56, %58, %cst_33 {dimension_numbers = #tpu.dot_dimension_numbers<[1], [0], [0], [1], [0, 0, 1, 1], [], []>} : vector<16x32xbf16>, vector<32x32xbf16>, vector<16x32xf32> -> vector<16x32xf32>
    %c0_34 = arith.constant 0 : index
    %c0_35 = arith.constant 0 : index
    %c0_36 = arith.constant 0 : index
    %60 = vector.load %arg11[%c0_34, %c0_35, %c0_36] : memref<4x1x32xf32, #tpu.memory_space<vmem>>, vector<1x1x32xf32>
    %61 = vector.shape_cast %60 : vector<1x1x32xf32> to vector<1x32xf32>
    %62 = vector.broadcast %61 : vector<1x32xf32> to vector<16x32xf32>
    %63 = arith.addf %59, %62 : vector<16x32xf32>
    %c0_37 = arith.constant 0 : index
    %c0_38 = arith.constant 0 : index
    %c0_39 = arith.constant 0 : index
    %64 = vector.load %arg12[%c0_37, %c0_38, %c0_39] : memref<4x1x32xf32, #tpu.memory_space<vmem>>, vector<1x1x32xf32>
    %65 = vector.shape_cast %64 : vector<1x1x32xf32> to vector<1x32xf32>
    %66 = vector.broadcast %65 : vector<1x32xf32> to vector<16x32xf32>
    %67 = arith.mulf %63, %66 : vector<16x32xf32>
    %c0_40 = arith.constant 0 : index
    %c0_41 = arith.constant 0 : index
    %c0_42 = arith.constant 0 : index
    %68 = vector.load %arg13[%c0_40, %c0_41, %c0_42] : memref<4x1x32xf32, #tpu.memory_space<vmem>>, vector<1x1x32xf32>
    %69 = vector.shape_cast %68 : vector<1x1x32xf32> to vector<1x32xf32>
    %70 = vector.broadcast %69 : vector<1x32xf32> to vector<16x32xf32>
    %71 = arith.addf %67, %70 : vector<16x32xf32>
    %cst_43 = arith.constant 0.000000e+00 : f32
    %72 = vector.broadcast %cst_43 : f32 to vector<16x32xf32>
    %73 = arith.maximumf %71, %72 : vector<16x32xf32>
    %74 = arith.addf %22, %73 : vector<16x32xf32>
    %c0_44 = arith.constant 0 : index
    %c0_45 = arith.constant 0 : index
    %c0_46 = arith.constant 0 : index
    %c0_47 = arith.constant 0 : index
    %75 = vector.load %arg14[%c0_44, %c0_45, %c0_46, %c0_47] : memref<1x4x16x32xf32, #tpu.memory_space<vmem>>, vector<1x1x16x32xf32>
    %76 = vector.shape_cast %75 : vector<1x1x16x32xf32> to vector<16x32xf32>
    %77 = vector.shape_cast %74 : vector<16x32xf32> to vector<1x1x16x32xf32>
    tpu.vector_store %arg14[%c0_44, %c0_45, %c0_46, %c0_47], %77 {strides = array<i32>} : memref<1x4x16x32xf32, #tpu.memory_space<vmem>>, vector<1x1x16x32xf32>,
    %78 = arith.truncf %74 : vector<16x32xf32> to vector<16x32xbf16>
    %c1 = arith.constant 1 : index
    %c0_48 = arith.constant 0 : index
    %c0_49 = arith.constant 0 : index
    %79 = vector.load %arg8[%c1, %c0_48, %c0_49] : memref<4x32x40xbf16, #tpu.memory_space<vmem>>, vector<1x32x40xbf16>
    %80 = vector.shape_cast %79 : vector<1x32x40xbf16> to vector<32x40xbf16>
    %cst_50 = arith.constant dense<0.000000e+00> : vector<16x40xf32>
    %81 = tpu.matmul %78, %80, %cst_50 {dimension_numbers = #tpu.dot_dimension_numbers<[1], [0], [0], [1], [0, 0, 1, 1], [], []>} : vector<16x32xbf16>, vector<32x40xbf16>, vector<16x40xf32> -> vector<16x40xf32>
    %82 = vector.extract_strided_slice %81 {offsets = [0, 0], sizes = [16, 32], strides = [1, 1]} : vector<16x40xf32> to vector<16x32xf32>
    %c1_51 = arith.constant 1 : index
    %c0_52 = arith.constant 0 : index
    %c0_53 = arith.constant 0 : index
    %83 = vector.load %arg9[%c1_51, %c0_52, %c0_53] : memref<4x1x32xf32, #tpu.memory_space<vmem>>, vector<1x1x32xf32>
    %84 = vector.shape_cast %83 : vector<1x1x32xf32> to vector<1x32xf32>
    %85 = vector.broadcast %84 : vector<1x32xf32> to vector<16x32xf32>
    %86 = arith.addf %82, %85 : vector<16x32xf32>
    %87 = vector.extract_strided_slice %81 {offsets = [0, 32], sizes = [16, 8], strides = [1, 1]} : vector<16x40xf32> to vector<16x8xf32>
    %88 = arith.truncf %87 : vector<16x8xf32> to vector<16x8xbf16>
    %cst_54 = arith.constant dense<0.000000e+00> : vector<16x16xf32>
    %89 = tpu.matmul %88, %88, %cst_54 {dimension_numbers = #tpu.dot_dimension_numbers<[1], [1], [0], [0], [0, 0, 1, 0], [], []>} : vector<16x8xbf16>, vector<16x8xbf16>, vector<16x16xf32> -> vector<16x16xf32>
    %cst_55 = arith.constant dense<0xFF800000> : vector<16xf32>
    %90 = vector.multi_reduction <maximumf>, %89, %cst_55 [1] : vector<16x16xf32> to vector<16xf32>
    %91 = vector.shape_cast %90 : vector<16xf32> to vector<16x1xf32>
    %92 = vector.broadcast %91 : vector<16x1xf32> to vector<16x16xf32>
    %93 = arith.subf %89, %92 : vector<16x16xf32>
    %94 = math.exp %93 : vector<16x16xf32>
    %cst_56 = arith.constant dense<0.000000e+00> : vector<16xf32>
    %95 = vector.multi_reduction <add>, %94, %cst_56 [1] : vector<16x16xf32> to vector<16xf32>
    %96 = vector.shape_cast %95 : vector<16xf32> to vector<16x1xf32>
    %97 = tpu.reciprocal %96 {approx = true} : vector<16x1xf32> -> vector<16x1xf32>
    %98 = vector.broadcast %97 : vector<16x1xf32> to vector<16x16xf32>
    %99 = arith.mulf %94, %98 : vector<16x16xf32>
    %cst_57 = arith.constant dense<0.000000e+00> : vector<16xf32>
    %100 = vector.multi_reduction <add>, %99, %cst_57 [0] : vector<16x16xf32> to vector<16xf32>
    %101 = vector.shape_cast %100 : vector<16xf32> to vector<1x16xf32>
    %cst_58 = arith.constant 9.99999971E-10 : f32
    %102 = vector.broadcast %cst_58 : f32 to vector<1x16xf32>
    %103 = arith.addf %102, %101 : vector<1x16xf32>
    %104 = tpu.reciprocal %103 {approx = true} : vector<1x16xf32> -> vector<1x16xf32>
    %105 = vector.broadcast %104 : vector<1x16xf32> to vector<16x16xf32>
    %106 = arith.mulf %99, %105 : vector<16x16xf32>
    %107 = arith.truncf %106 : vector<16x16xf32> to vector<16x16xbf16>
    %108 = arith.truncf %86 : vector<16x32xf32> to vector<16x32xbf16>
    %cst_59 = arith.constant dense<0.000000e+00> : vector<16x32xf32>
    %109 = tpu.matmul %107, %108, %cst_59 {dimension_numbers = #tpu.dot_dimension_numbers<[0], [0], [1], [1], [0, 1, 1, 1], [], []>} : vector<16x16xbf16>, vector<16x32xbf16>, vector<16x32xf32> -> vector<16x32xf32>
    %110 = arith.subf %74, %109 : vector<16x32xf32>
    %111 = arith.truncf %110 : vector<16x32xf32> to vector<16x32xbf16>
    %c1_60 = arith.constant 1 : index
    %c0_61 = arith.constant 0 : index
    %c0_62 = arith.constant 0 : index
    %112 = vector.load %arg10[%c1_60, %c0_61, %c0_62] : memref<4x32x32xbf16, #tpu.memory_space<vmem>>, vector<1x32x32xbf16>
    %113 = vector.shape_cast %112 : vector<1x32x32xbf16> to vector<32x32xbf16>
    %cst_63 = arith.constant dense<0.000000e+00> : vector<16x32xf32>
    %114 = tpu.matmul %111, %113, %cst_63 {dimension_numbers = #tpu.dot_dimension_numbers<[1], [0], [0], [1], [0, 0, 1, 1], [], []>} : vector<16x32xbf16>, vector<32x32xbf16>, vector<16x32xf32> -> vector<16x32xf32>
    %c1_64 = arith.constant 1 : index
    %c0_65 = arith.constant 0 : index
    %c0_66 = arith.constant 0 : index
    %115 = vector.load %arg11[%c1_64, %c0_65, %c0_66] : memref<4x1x32xf32, #tpu.memory_space<vmem>>, vector<1x1x32xf32>
    %116 = vector.shape_cast %115 : vector<1x1x32xf32> to vector<1x32xf32>
    %117 = vector.broadcast %116 : vector<1x32xf32> to vector<16x32xf32>
    %118 = arith.addf %114, %117 : vector<16x32xf32>
    %c1_67 = arith.constant 1 : index
    %c0_68 = arith.constant 0 : index
    %c0_69 = arith.constant 0 : index
    %119 = vector.load %arg12[%c1_67, %c0_68, %c0_69] : memref<4x1x32xf32, #tpu.memory_space<vmem>>, vector<1x1x32xf32>
    %120 = vector.shape_cast %119 : vector<1x1x32xf32> to vector<1x32xf32>
    %121 = vector.broadcast %120 : vector<1x32xf32> to vector<16x32xf32>
    %122 = arith.mulf %118, %121 : vector<16x32xf32>
    %c1_70 = arith.constant 1 : index
    %c0_71 = arith.constant 0 : index
    %c0_72 = arith.constant 0 : index
    %123 = vector.load %arg13[%c1_70, %c0_71, %c0_72] : memref<4x1x32xf32, #tpu.memory_space<vmem>>, vector<1x1x32xf32>
    %124 = vector.shape_cast %123 : vector<1x1x32xf32> to vector<1x32xf32>
    %125 = vector.broadcast %124 : vector<1x32xf32> to vector<16x32xf32>
    %126 = arith.addf %122, %125 : vector<16x32xf32>
    %cst_73 = arith.constant 0.000000e+00 : f32
    %127 = vector.broadcast %cst_73 : f32 to vector<16x32xf32>
    %128 = arith.maximumf %126, %127 : vector<16x32xf32>
    %129 = arith.addf %74, %128 : vector<16x32xf32>
    %c0_74 = arith.constant 0 : index
    %c1_75 = arith.constant 1 : index
    %c0_76 = arith.constant 0 : index
    %c0_77 = arith.constant 0 : index
    %130 = vector.load %arg14[%c0_74, %c1_75, %c0_76, %c0_77] : memref<1x4x16x32xf32, #tpu.memory_space<vmem>>, vector<1x1x16x32xf32>
    %131 = vector.shape_cast %130 : vector<1x1x16x32xf32> to vector<16x32xf32>
    %132 = vector.shape_cast %129 : vector<16x32xf32> to vector<1x1x16x32xf32>
    tpu.vector_store %arg14[%c0_74, %c1_75, %c0_76, %c0_77], %132 {strides = array<i32>} : memref<1x4x16x32xf32, #tpu.memory_space<vmem>>, vector<1x1x16x32xf32>,
    %133 = arith.truncf %129 : vector<16x32xf32> to vector<16x32xbf16>
    %c2 = arith.constant 2 : index
    %c0_78 = arith.constant 0 : index
    %c0_79 = arith.constant 0 : index
    %134 = vector.load %arg8[%c2, %c0_78, %c0_79] : memref<4x32x40xbf16, #tpu.memory_space<vmem>>, vector<1x32x40xbf16>
    %135 = vector.shape_cast %134 : vector<1x32x40xbf16> to vector<32x40xbf16>
    %cst_80 = arith.constant dense<0.000000e+00> : vector<16x40xf32>
    %136 = tpu.matmul %133, %135, %cst_80 {dimension_numbers = #tpu.dot_dimension_numbers<[1], [0], [0], [1], [0, 0, 1, 1], [], []>} : vector<16x32xbf16>, vector<32x40xbf16>, vector<16x40xf32> -> vector<16x40xf32>
    %137 = vector.extract_strided_slice %136 {offsets = [0, 0], sizes = [16, 32], strides = [1, 1]} : vector<16x40xf32> to vector<16x32xf32>
    %c2_81 = arith.constant 2 : index
    %c0_82 = arith.constant 0 : index
    %c0_83 = arith.constant 0 : index
    %138 = vector.load %arg9[%c2_81, %c0_82, %c0_83] : memref<4x1x32xf32, #tpu.memory_space<vmem>>, vector<1x1x32xf32>
    %139 = vector.shape_cast %138 : vector<1x1x32xf32> to vector<1x32xf32>
    %140 = vector.broadcast %139 : vector<1x32xf32> to vector<16x32xf32>
    %141 = arith.addf %137, %140 : vector<16x32xf32>
    %142 = vector.extract_strided_slice %136 {offsets = [0, 32], sizes = [16, 8], strides = [1, 1]} : vector<16x40xf32> to vector<16x8xf32>
    %143 = arith.truncf %142 : vector<16x8xf32> to vector<16x8xbf16>
    %cst_84 = arith.constant dense<0.000000e+00> : vector<16x16xf32>
    %144 = tpu.matmul %143, %143, %cst_84 {dimension_numbers = #tpu.dot_dimension_numbers<[1], [1], [0], [0], [0, 0, 1, 0], [], []>} : vector<16x8xbf16>, vector<16x8xbf16>, vector<16x16xf32> -> vector<16x16xf32>
    %cst_85 = arith.constant dense<0xFF800000> : vector<16xf32>
    %145 = vector.multi_reduction <maximumf>, %144, %cst_85 [1] : vector<16x16xf32> to vector<16xf32>
    %146 = vector.shape_cast %145 : vector<16xf32> to vector<16x1xf32>
    %147 = vector.broadcast %146 : vector<16x1xf32> to vector<16x16xf32>
    %148 = arith.subf %144, %147 : vector<16x16xf32>
    %149 = math.exp %148 : vector<16x16xf32>
    %cst_86 = arith.constant dense<0.000000e+00> : vector<16xf32>
    %150 = vector.multi_reduction <add>, %149, %cst_86 [1] : vector<16x16xf32> to vector<16xf32>
    %151 = vector.shape_cast %150 : vector<16xf32> to vector<16x1xf32>
    %152 = tpu.reciprocal %151 {approx = true} : vector<16x1xf32> -> vector<16x1xf32>
    %153 = vector.broadcast %152 : vector<16x1xf32> to vector<16x16xf32>
    %154 = arith.mulf %149, %153 : vector<16x16xf32>
    %cst_87 = arith.constant dense<0.000000e+00> : vector<16xf32>
    %155 = vector.multi_reduction <add>, %154, %cst_87 [0] : vector<16x16xf32> to vector<16xf32>
    %156 = vector.shape_cast %155 : vector<16xf32> to vector<1x16xf32>
    %cst_88 = arith.constant 9.99999971E-10 : f32
    %157 = vector.broadcast %cst_88 : f32 to vector<1x16xf32>
    %158 = arith.addf %157, %156 : vector<1x16xf32>
    %159 = tpu.reciprocal %158 {approx = true} : vector<1x16xf32> -> vector<1x16xf32>
    %160 = vector.broadcast %159 : vector<1x16xf32> to vector<16x16xf32>
    %161 = arith.mulf %154, %160 : vector<16x16xf32>
    %162 = arith.truncf %161 : vector<16x16xf32> to vector<16x16xbf16>
    %163 = arith.truncf %141 : vector<16x32xf32> to vector<16x32xbf16>
    %cst_89 = arith.constant dense<0.000000e+00> : vector<16x32xf32>
    %164 = tpu.matmul %162, %163, %cst_89 {dimension_numbers = #tpu.dot_dimension_numbers<[0], [0], [1], [1], [0, 1, 1, 1], [], []>} : vector<16x16xbf16>, vector<16x32xbf16>, vector<16x32xf32> -> vector<16x32xf32>
    %165 = arith.subf %129, %164 : vector<16x32xf32>
    %166 = arith.truncf %165 : vector<16x32xf32> to vector<16x32xbf16>
    %c2_90 = arith.constant 2 : index
    %c0_91 = arith.constant 0 : index
    %c0_92 = arith.constant 0 : index
    %167 = vector.load %arg10[%c2_90, %c0_91, %c0_92] : memref<4x32x32xbf16, #tpu.memory_space<vmem>>, vector<1x32x32xbf16>
    %168 = vector.shape_cast %167 : vector<1x32x32xbf16> to vector<32x32xbf16>
    %cst_93 = arith.constant dense<0.000000e+00> : vector<16x32xf32>
    %169 = tpu.matmul %166, %168, %cst_93 {dimension_numbers = #tpu.dot_dimension_numbers<[1], [0], [0], [1], [0, 0, 1, 1], [], []>} : vector<16x32xbf16>, vector<32x32xbf16>, vector<16x32xf32> -> vector<16x32xf32>
    %c2_94 = arith.constant 2 : index
    %c0_95 = arith.constant 0 : index
    %c0_96 = arith.constant 0 : index
    %170 = vector.load %arg11[%c2_94, %c0_95, %c0_96] : memref<4x1x32xf32, #tpu.memory_space<vmem>>, vector<1x1x32xf32>
    %171 = vector.shape_cast %170 : vector<1x1x32xf32> to vector<1x32xf32>
    %172 = vector.broadcast %171 : vector<1x32xf32> to vector<16x32xf32>
    %173 = arith.addf %169, %172 : vector<16x32xf32>
    %c2_97 = arith.constant 2 : index
    %c0_98 = arith.constant 0 : index
    %c0_99 = arith.constant 0 : index
    %174 = vector.load %arg12[%c2_97, %c0_98, %c0_99] : memref<4x1x32xf32, #tpu.memory_space<vmem>>, vector<1x1x32xf32>
    %175 = vector.shape_cast %174 : vector<1x1x32xf32> to vector<1x32xf32>
    %176 = vector.broadcast %175 : vector<1x32xf32> to vector<16x32xf32>
    %177 = arith.mulf %173, %176 : vector<16x32xf32>
    %c2_100 = arith.constant 2 : index
    %c0_101 = arith.constant 0 : index
    %c0_102 = arith.constant 0 : index
    %178 = vector.load %arg13[%c2_100, %c0_101, %c0_102] : memref<4x1x32xf32, #tpu.memory_space<vmem>>, vector<1x1x32xf32>
    %179 = vector.shape_cast %178 : vector<1x1x32xf32> to vector<1x32xf32>
    %180 = vector.broadcast %179 : vector<1x32xf32> to vector<16x32xf32>
    %181 = arith.addf %177, %180 : vector<16x32xf32>
    %cst_103 = arith.constant 0.000000e+00 : f32
    %182 = vector.broadcast %cst_103 : f32 to vector<16x32xf32>
    %183 = arith.maximumf %181, %182 : vector<16x32xf32>
    %184 = arith.addf %129, %183 : vector<16x32xf32>
    %c0_104 = arith.constant 0 : index
    %c2_105 = arith.constant 2 : index
    %c0_106 = arith.constant 0 : index
    %c0_107 = arith.constant 0 : index
    %185 = vector.load %arg14[%c0_104, %c2_105, %c0_106, %c0_107] : memref<1x4x16x32xf32, #tpu.memory_space<vmem>>, vector<1x1x16x32xf32>
    %186 = vector.shape_cast %185 : vector<1x1x16x32xf32> to vector<16x32xf32>
    %187 = vector.shape_cast %184 : vector<16x32xf32> to vector<1x1x16x32xf32>
    tpu.vector_store %arg14[%c0_104, %c2_105, %c0_106, %c0_107], %187 {strides = array<i32>} : memref<1x4x16x32xf32, #tpu.memory_space<vmem>>, vector<1x1x16x32xf32>,
    %188 = arith.truncf %184 : vector<16x32xf32> to vector<16x32xbf16>
    %c3 = arith.constant 3 : index
    %c0_108 = arith.constant 0 : index
    %c0_109 = arith.constant 0 : index
    %189 = vector.load %arg8[%c3, %c0_108, %c0_109] : memref<4x32x40xbf16, #tpu.memory_space<vmem>>, vector<1x32x40xbf16>
    %190 = vector.shape_cast %189 : vector<1x32x40xbf16> to vector<32x40xbf16>
    %cst_110 = arith.constant dense<0.000000e+00> : vector<16x40xf32>
    %191 = tpu.matmul %188, %190, %cst_110 {dimension_numbers = #tpu.dot_dimension_numbers<[1], [0], [0], [1], [0, 0, 1, 1], [], []>} : vector<16x32xbf16>, vector<32x40xbf16>, vector<16x40xf32> -> vector<16x40xf32>
    %192 = vector.extract_strided_slice %191 {offsets = [0, 0], sizes = [16, 32], strides = [1, 1]} : vector<16x40xf32> to vector<16x32xf32>
    %c3_111 = arith.constant 3 : index
    %c0_112 = arith.constant 0 : index
    %c0_113 = arith.constant 0 : index
    %193 = vector.load %arg9[%c3_111, %c0_112, %c0_113] : memref<4x1x32xf32, #tpu.memory_space<vmem>>, vector<1x1x32xf32>
    %194 = vector.shape_cast %193 : vector<1x1x32xf32> to vector<1x32xf32>
    %195 = vector.broadcast %194 : vector<1x32xf32> to vector<16x32xf32>
    %196 = arith.addf %192, %195 : vector<16x32xf32>
    %197 = vector.extract_strided_slice %191 {offsets = [0, 32], sizes = [16, 8], strides = [1, 1]} : vector<16x40xf32> to vector<16x8xf32>
    %198 = arith.truncf %197 : vector<16x8xf32> to vector<16x8xbf16>
    %cst_114 = arith.constant dense<0.000000e+00> : vector<16x16xf32>
    %199 = tpu.matmul %198, %198, %cst_114 {dimension_numbers = #tpu.dot_dimension_numbers<[1], [1], [0], [0], [0, 0, 1, 0], [], []>} : vector<16x8xbf16>, vector<16x8xbf16>, vector<16x16xf32> -> vector<16x16xf32>
    %cst_115 = arith.constant dense<0xFF800000> : vector<16xf32>
    %200 = vector.multi_reduction <maximumf>, %199, %cst_115 [1] : vector<16x16xf32> to vector<16xf32>
    %201 = vector.shape_cast %200 : vector<16xf32> to vector<16x1xf32>
    %202 = vector.broadcast %201 : vector<16x1xf32> to vector<16x16xf32>
    %203 = arith.subf %199, %202 : vector<16x16xf32>
    %204 = math.exp %203 : vector<16x16xf32>
    %cst_116 = arith.constant dense<0.000000e+00> : vector<16xf32>
    %205 = vector.multi_reduction <add>, %204, %cst_116 [1] : vector<16x16xf32> to vector<16xf32>
    %206 = vector.shape_cast %205 : vector<16xf32> to vector<16x1xf32>
    %207 = tpu.reciprocal %206 {approx = true} : vector<16x1xf32> -> vector<16x1xf32>
    %208 = vector.broadcast %207 : vector<16x1xf32> to vector<16x16xf32>
    %209 = arith.mulf %204, %208 : vector<16x16xf32>
    %cst_117 = arith.constant dense<0.000000e+00> : vector<16xf32>
    %210 = vector.multi_reduction <add>, %209, %cst_117 [0] : vector<16x16xf32> to vector<16xf32>
    %211 = vector.shape_cast %210 : vector<16xf32> to vector<1x16xf32>
    %cst_118 = arith.constant 9.99999971E-10 : f32
    %212 = vector.broadcast %cst_118 : f32 to vector<1x16xf32>
    %213 = arith.addf %212, %211 : vector<1x16xf32>
    %214 = tpu.reciprocal %213 {approx = true} : vector<1x16xf32> -> vector<1x16xf32>
    %215 = vector.broadcast %214 : vector<1x16xf32> to vector<16x16xf32>
    %216 = arith.mulf %209, %215 : vector<16x16xf32>
    %217 = arith.truncf %216 : vector<16x16xf32> to vector<16x16xbf16>
    %218 = arith.truncf %196 : vector<16x32xf32> to vector<16x32xbf16>
    %cst_119 = arith.constant dense<0.000000e+00> : vector<16x32xf32>
    %219 = tpu.matmul %217, %218, %cst_119 {dimension_numbers = #tpu.dot_dimension_numbers<[0], [0], [1], [1], [0, 1, 1, 1], [], []>} : vector<16x16xbf16>, vector<16x32xbf16>, vector<16x32xf32> -> vector<16x32xf32>
    %220 = arith.subf %184, %219 : vector<16x32xf32>
    %221 = arith.truncf %220 : vector<16x32xf32> to vector<16x32xbf16>
    %c3_120 = arith.constant 3 : index
    %c0_121 = arith.constant 0 : index
    %c0_122 = arith.constant 0 : index
    %222 = vector.load %arg10[%c3_120, %c0_121, %c0_122] : memref<4x32x32xbf16, #tpu.memory_space<vmem>>, vector<1x32x32xbf16>
    %223 = vector.shape_cast %222 : vector<1x32x32xbf16> to vector<32x32xbf16>
    %cst_123 = arith.constant dense<0.000000e+00> : vector<16x32xf32>
    %224 = tpu.matmul %221, %223, %cst_123 {dimension_numbers = #tpu.dot_dimension_numbers<[1], [0], [0], [1], [0, 0, 1, 1], [], []>} : vector<16x32xbf16>, vector<32x32xbf16>, vector<16x32xf32> -> vector<16x32xf32>
    %c3_124 = arith.constant 3 : index
    %c0_125 = arith.constant 0 : index
    %c0_126 = arith.constant 0 : index
    %225 = vector.load %arg11[%c3_124, %c0_125, %c0_126] : memref<4x1x32xf32, #tpu.memory_space<vmem>>, vector<1x1x32xf32>
    %226 = vector.shape_cast %225 : vector<1x1x32xf32> to vector<1x32xf32>
    %227 = vector.broadcast %226 : vector<1x32xf32> to vector<16x32xf32>
    %228 = arith.addf %224, %227 : vector<16x32xf32>
    %c3_127 = arith.constant 3 : index
    %c0_128 = arith.constant 0 : index
    %c0_129 = arith.constant 0 : index
    %229 = vector.load %arg12[%c3_127, %c0_128, %c0_129] : memref<4x1x32xf32, #tpu.memory_space<vmem>>, vector<1x1x32xf32>
    %230 = vector.shape_cast %229 : vector<1x1x32xf32> to vector<1x32xf32>
    %231 = vector.broadcast %230 : vector<1x32xf32> to vector<16x32xf32>
    %232 = arith.mulf %228, %231 : vector<16x32xf32>
    %c3_130 = arith.constant 3 : index
    %c0_131 = arith.constant 0 : index
    %c0_132 = arith.constant 0 : index
    %233 = vector.load %arg13[%c3_130, %c0_131, %c0_132] : memref<4x1x32xf32, #tpu.memory_space<vmem>>, vector<1x1x32xf32>
    %234 = vector.shape_cast %233 : vector<1x1x32xf32> to vector<1x32xf32>
    %235 = vector.broadcast %234 : vector<1x32xf32> to vector<16x32xf32>
    %236 = arith.addf %232, %235 : vector<16x32xf32>
    %cst_133 = arith.constant 0.000000e+00 : f32
    %237 = vector.broadcast %cst_133 : f32 to vector<16x32xf32>
    %238 = arith.maximumf %236, %237 : vector<16x32xf32>
    %239 = arith.addf %184, %238 : vector<16x32xf32>
    %c0_134 = arith.constant 0 : index
    %c3_135 = arith.constant 3 : index
    %c0_136 = arith.constant 0 : index
    %c0_137 = arith.constant 0 : index
    %240 = vector.load %arg14[%c0_134, %c3_135, %c0_136, %c0_137] : memref<1x4x16x32xf32, #tpu.memory_space<vmem>>, vector<1x1x16x32xf32>
    %241 = vector.shape_cast %240 : vector<1x1x16x32xf32> to vector<16x32xf32>
    %242 = vector.shape_cast %239 : vector<16x32xf32> to vector<1x1x16x32xf32>
    tpu.vector_store %arg14[%c0_134, %c3_135, %c0_136, %c0_137], %242 {strides = array<i32>} : memref<1x4x16x32xf32, #tpu.memory_space<vmem>>, vector<1x1x16x32xf32>,
    return
  }
  func.func @transform_0(%arg0: i32) -> (i32, i32, i32) {
    %c0_i32 = arith.constant 0 : i32
    %c0_i32_0 = arith.constant 0 : i32
    %c0_i32_1 = arith.constant 0 : i32
    return %arg0, %c0_i32, %c0_i32_0 : i32, i32, i32
  }
  func.func @transform_1(%arg0: i32) -> (i32, i32) {
    %c0_i32 = arith.constant 0 : i32
    %c0_i32_0 = arith.constant 0 : i32
    %c0_i32_1 = arith.constant 0 : i32
    return %c0_i32, %c0_i32_0 : i32, i32
  }
  func.func @transform_2(%arg0: i32) -> (i32, i32) {
    %c0_i32 = arith.constant 0 : i32
    %c0_i32_0 = arith.constant 0 : i32
    %c0_i32_1 = arith.constant 0 : i32
    return %c0_i32, %c0_i32_0 : i32, i32
  }
  func.func @transform_3(%arg0: i32) -> (i32, i32) {
    %c0_i32 = arith.constant 0 : i32
    %c0_i32_0 = arith.constant 0 : i32
    %c0_i32_1 = arith.constant 0 : i32
    return %c0_i32, %c0_i32_0 : i32, i32
  }
  func.func @transform_4(%arg0: i32) -> (i32, i32) {
    %c0_i32 = arith.constant 0 : i32
    %c0_i32_0 = arith.constant 0 : i32
    %c0_i32_1 = arith.constant 0 : i32
    return %c0_i32, %c0_i32_0 : i32, i32
  }
  func.func @transform_5(%arg0: i32) -> (i32, i32) {
    %c0_i32 = arith.constant 0 : i32
    %c0_i32_0 = arith.constant 0 : i32
    %c0_i32_1 = arith.constant 0 : i32
    return %c0_i32, %c0_i32_0 : i32, i32
  }
  func.func @transform_6(%arg0: i32) -> (i32, i32) {
    %c0_i32 = arith.constant 0 : i32
    %c0_i32_0 = arith.constant 0 : i32
    %c0_i32_1 = arith.constant 0 : i32
    return %c0_i32, %c0_i32_0 : i32, i32
  }
  func.func @transform_7(%arg0: i32) -> (i32, i32, i32) {
    %c0_i32 = arith.constant 0 : i32
    %c0_i32_0 = arith.constant 0 : i32
    %c0_i32_1 = arith.constant 0 : i32
    %c0_i32_2 = arith.constant 0 : i32
    return %c0_i32, %c0_i32_0, %c0_i32_1 : i32, i32, i32
  }
  func.func @transform_8(%arg0: i32) -> (i32, i32, i32) {
    %c0_i32 = arith.constant 0 : i32
    %c0_i32_0 = arith.constant 0 : i32
    %c0_i32_1 = arith.constant 0 : i32
    %c0_i32_2 = arith.constant 0 : i32
    return %c0_i32, %c0_i32_0, %c0_i32_1 : i32, i32, i32
  }
  func.func @transform_9(%arg0: i32) -> (i32, i32, i32) {
    %c0_i32 = arith.constant 0 : i32
    %c0_i32_0 = arith.constant 0 : i32
    %c0_i32_1 = arith.constant 0 : i32
    %c0_i32_2 = arith.constant 0 : i32
    return %c0_i32, %c0_i32_0, %c0_i32_1 : i32, i32, i32
  }
  func.func @transform_10(%arg0: i32) -> (i32, i32, i32) {
    %c0_i32 = arith.constant 0 : i32
    %c0_i32_0 = arith.constant 0 : i32
    %c0_i32_1 = arith.constant 0 : i32
    %c0_i32_2 = arith.constant 0 : i32
    return %c0_i32, %c0_i32_0, %c0_i32_1 : i32, i32, i32
  }
  func.func @transform_11(%arg0: i32) -> (i32, i32, i32) {
    %c0_i32 = arith.constant 0 : i32
    %c0_i32_0 = arith.constant 0 : i32
    %c0_i32_1 = arith.constant 0 : i32
    %c0_i32_2 = arith.constant 0 : i32
    return %c0_i32, %c0_i32_0, %c0_i32_1 : i32, i32, i32
  }
  func.func @transform_12(%arg0: i32) -> (i32, i32, i32) {
    %c0_i32 = arith.constant 0 : i32
    %c0_i32_0 = arith.constant 0 : i32
    %c0_i32_1 = arith.constant 0 : i32
    %c0_i32_2 = arith.constant 0 : i32
    return %c0_i32, %c0_i32_0, %c0_i32_1 : i32, i32, i32
  }
  func.func @transform_13(%arg0: i32) -> (i32, i32, i32, i32) {
    %c0_i32 = arith.constant 0 : i32
    %c0_i32_0 = arith.constant 0 : i32
    %c0_i32_1 = arith.constant 0 : i32
    %c0_i32_2 = arith.constant 0 : i32
    return %arg0, %c0_i32, %c0_i32_0, %c0_i32_1 : i32, i32, i32, i32
  }
}

</mosaic_0001>

<bundles_post_ra>
// kernel: tpu_custom_call.1
= control target key start
LH: loop header
LB: loop body
LE: loop exit
PB: predicated region body
PF: predicated region fallthrough
CT: control target
= control target key end

     0   :  { %s2946_s0 = inlined_call_operand.hbm [shape: bf16[2,16,32], index: 0, kind: input, shape index: {}]   ;;  %s2947_s1 = inlined_call_operand.hbm [shape: bf16[32,32], index: 1, kind: input, shape index: {}]   ;;  %s2948_s2 = inlined_call_operand.hbm [shape: f32[1,32], index: 2, kind: input, shape index: {}]   ;;  %s2949_s3 = inlined_call_operand.hbm [shape: f32[1,32], index: 3, kind: input, shape index: {}]   ;;  %s2950_s4 = inlined_call_operand.hbm [shape: bf16[32,32], index: 4, kind: input, shape index: {}]   ;;  %s2951_s5 = inlined_call_operand.hbm [shape: f32[1,32], index: 5, kind: input, shape index: {}]   ;;  %s2952_s6 = inlined_call_operand.hbm [shape: f32[1,32], index: 6, kind: input, shape index: {}]   ;;  %s2953_s7 = inlined_call_operand.hbm [shape: bf16[4,32,40], index: 7, kind: input, shape index: {}]   ;;  %s2954_s8 = inlined_call_operand.vmem [shape: f32[4,1,32], index: 8, kind: input, shape index: {}]   ;;  %s2955_s9 = inlined_call_operand.hbm [shape: bf16[4,32,32], index: 9, kind: input, shape index: {}]   ;;  %s2956_s10 = inlined_call_operand.vmem [shape: f32[4,1,32], index: 10, kind: input, shape index: {}]   ;;  %s2957_s11 = inlined_call_operand.hbm [shape: f32[4,1,32], index: 11, kind: input, shape index: {}]   ;;  %s2958_s12 = inlined_call_operand.hbm [shape: f32[4,1,32], index: 12, kind: input, shape index: {}]   ;;  %s2959_s13 = inlined_call_operand.hbm [shape: f32[2,4,16,32], index: 13, kind: output, shape index: {}]  }
   0x1   :  { %2966 = sst [smem:[#allocation28_spill]] %s2947_s1 }
   0x2   :  { %2967 = sst [smem:[#allocation29_spill]] %s2948_s2 }
   0x3   :  { %2968 = sst [smem:[#allocation30_spill]] %s2949_s3 }
   0x4   :  { %2969 = sst [smem:[#allocation31_spill]] %s2950_s4 }
   0x5   :  { %2970 = sst [smem:[#allocation32_spill]] %s2951_s5 }
   0x6   :  { %2971 = sst [smem:[#allocation33_spill]] %s2952_s6 }
   0x7   :  { %2972 = sst [smem:[#allocation34_spill]] %s2954_s8 }
   0x8   :  { %2973 = sst [smem:[#allocation35_spill]] %s2956_s10 }
   0x9   :  { %2974 = sst [smem:[#allocation36_spill]] %s2959_s13 }
   0xa   :  { %18 = vsyncpa [#allocation3], 0 }
   0xb   :  { %20 = vsyncpa [#allocation3 + $0x1], 0 }
   0xc   :  { %21 = vsyncpa [#allocation6], 0 }
   0xd   :  { %22 = vsyncpa [#allocation9], 0 }
   0xe   :  { %23 = vsyncpa [#allocation12], 0 }
   0xf   :  { %24 = vsyncpa [#allocation15], 0 }
  0x10   :  { %25 = vsyncpa [#allocation18], 0 }
  0x11   :  { %26 = vsyncpa [#allocation4], 0 }
  0x12   :  { %28 = vsyncpa [#allocation4 + $0x1], 0  ;;  %s2576_s25 = smov 0   ;;  %s2578_s26 = smov 0  }
  0x13   :  { %s2580_s27 = smov 0   ;;  %s2582_s28 = smov 0  }
  0x14 LB: > { %s2975_s1 = sld [smem:[#allocation28_spill]]  ;;  %s2600_s15 = sadd.s32 4294967295, %s2487_s28   ;;  %s2487_s28 = sphi %s2582_s28, %s2997_s28   ;;  %s2483_s27 = sphi %s2580_s27, %s2996_s27   ;;  %s2479_s26 = sphi %s2578_s26, %s2995_s26   ;;  %s2475_s25 = sphi %s2576_s25, %s2994_s25  }
  0x15   : > { %p1686_p0 = scmp.ge.s32.totalorder %s2487_s28, 1  ;;  %p55_p1 = scmp.eq.s32.totalorder %s2600_s15, 0 }
  0x16   : > { %p343_p2 = scmp.lt.s32.totalorder %s2487_s28, 3  ;;  %s2489_s17 = smov [#allocation5]  }
  0x17   : > { %s356_s18 = sshll.u32 %s2489_s17, 4  ;;  %s2977_s3 = sld [smem:[#allocation30_spill]]  ;;  %s357_s18 = int_to_ptr.vmem [resolvable:$true] %s356_s18 }
  0x18   : > { %p2605_p3 = pnand %p1686_p0, %p343_p2  ;;  %s2979_s5 = sld [smem:[#allocation32_spill]] }
  0x19   : > { %s2490_s30 = smov [#allocation8]   ;;  %s2965_s13 = smov 4  }
  0x1a   : > { %s354_s14 = sshll.u32 %s2975_s1, 4  ;;  %p1900_p4 = pneg %p2605_p3  ;;  %s355_s14 = int_to_ptr.hbm [resolvable:$true] %s354_s14 }
  0x1b   : > { %s383_s17 = sshll.u32 %s2490_s30, 4  ;;  %s2963_s1 = smov 64   ;;  %s384_s17 = int_to_ptr.vmem [resolvable:$true] %s383_s17 }
  0x1c   : > { %p2617_p6 = pnand %p1900_p4, %p55_p1  ;;  %s2493_s23 = smov [#allocation11]  }
  0x1d   : > { %s381_s21 = sshll.u32 %s2977_s3, 4  ;;  %s430_s3 = sshll.u32 %s2953_s7, 4  ;;  %s382_s21 = int_to_ptr.hbm [resolvable:$true] %s381_s21  ;;  %s431_s3 = int_to_ptr.hbm [resolvable:$true] %s430_s3 }
  0x1e   : > { %s407_s29 = sshll.u32 %s2979_s5, 4  ;;  %s409_s24 = sshll.u32 %s2493_s23, 4  ;;  %s408_s29 = int_to_ptr.hbm [resolvable:$true] %s407_s29  ;;  %s410_s24 = int_to_ptr.vmem [resolvable:$true] %s409_s24 }
  0x1f   : > { %1903 = dma.hbm_to_vmem [thread:$0]  (!%p2617_p6), %s355_s14, 256, %s357_s18, [#allocation6], %s2963_s1, %s2963_s1, %s2965_s13  }
  0x20   : > { %1909 = dma.hbm_to_vmem [thread:$0]  (!%p2617_p6), %s382_s21, 16, %s384_s17, [#allocation9]  }
  0x21   : > { %1915 = dma.hbm_to_vmem [thread:$0]  (!%p2617_p6), %s408_s29, 16, %s410_s24, [#allocation12]  }
  0x22   : > { %s2494_s30 = smov [#allocation14]   ;;  %s464_s14 = sshll.u32 %s2957_s11, 4  ;;  %s465_s14 = int_to_ptr.hbm [resolvable:$true] %s464_s14 }
  0x23   : > { %s432_s5 = sshll.u32 %s2494_s30, 4  ;;  %s2495_s18 = smov [#allocation17]   ;;  %s433_s5 = int_to_ptr.vmem [resolvable:$true] %s432_s5 }
  0x24   : > { %1921 = dma.hbm_to_vmem [thread:$0]  (!%p2617_p6), %s431_s3, 1024, %s433_s5, [#allocation15], %s2963_s1, %s2963_s1, %s2965_s13  }
  0x25   : > { %s466_s21 = sshll.u32 %s2495_s18, 4  ;;  %s2980_s2 = sld [smem:[#allocation29_spill]]  ;;  %s467_s21 = int_to_ptr.vmem [resolvable:$true] %s466_s21 }
  0x26   : > { %s2496_s20 = smov 16   ;;  %s2497_s23 = smov 1  }
  0x27   : > { %1927 = dma.hbm_to_vmem [thread:$0]  (!%p2617_p6), %s465_s14, 64, %s467_s21, [#allocation18], %s2496_s20, %s2496_s20, %s2497_s23  }
  0x28   : > { %s2498_s8 = smov [#allocation7]   ;;  %s2981_s4 = sld [smem:[#allocation31_spill]] }
  0x29   : > { %s371_s10 = sshll.u32 %s2498_s8, 4  ;;  %s2982_s6 = sld [smem:[#allocation33_spill]]  ;;  %s372_s10 = int_to_ptr.vmem [resolvable:$true] %s371_s10 }
  0x2a   : > { %s2499_s19 = smov [#allocation10]   ;;  %s2983_s14 = smov 64  }
  0x2b   : > { %s369_s29 = sshll.u32 %s2980_s2, 4  ;;  %s394_s1 = sshll.u32 %s2499_s19, 4  ;;  %s370_s29 = int_to_ptr.hbm [resolvable:$true] %s369_s29  ;;  %s395_s1 = int_to_ptr.vmem [resolvable:$true] %s394_s1 }
  0x2c   : > { %1906 = dma.hbm_to_vmem [thread:$0]  (!%p2617_p6), %s370_s29, 16, %s372_s10, [#allocation6]  }
  0x2d   : > { %s2500_s21 = smov [#allocation13]   ;;  %s447_s10 = sshll.u32 %s2955_s9, 4  ;;  %s448_s10 = int_to_ptr.hbm [resolvable:$true] %s447_s10 }
  0x2e   : > { %s392_s5 = sshll.u32 %s2981_s4, 4  ;;  %s421_s8 = sshll.u32 %s2500_s21, 4  ;;  %s393_s5 = int_to_ptr.hbm [resolvable:$true] %s392_s5  ;;  %s422_s8 = int_to_ptr.vmem [resolvable:$true] %s421_s8 }
  0x2f   : > { %s419_s17 = sshll.u32 %s2982_s6, 4  ;;  %s1685_s21 = sadd.s32 4294967294, %s2487_s28   ;;  %s420_s17 = int_to_ptr.hbm [resolvable:$true] %s419_s17 }
  0x30   : > { %1912 = dma.hbm_to_vmem [thread:$0]  (!%p2617_p6), %s393_s5, 256, %s395_s1, [#allocation9], %s2983_s14, %s2983_s14, %s2965_s13  }
  0x31   : > { %1918 = dma.hbm_to_vmem [thread:$0]  (!%p2617_p6), %s420_s17, 16, %s422_s8, [#allocation12]  }
  0x32   : > { %s478_s1 = sshll.u32 %s2958_s12, 4  ;;  %s2501_s5 = smov [#allocation16]   ;;  %s479_s1 = int_to_ptr.hbm [resolvable:$true] %s478_s1 }
  0x33   : > { %s449_s18 = sshll.u32 %s2501_s5, 4  ;;  %s2502_s17 = smov [#allocation19]   ;;  %s450_s18 = int_to_ptr.vmem [resolvable:$true] %s449_s18 }
  0x34   : > { %1924 = dma.hbm_to_vmem [thread:$0]  (!%p2617_p6), %s448_s10, 1024, %s450_s18, [#allocation15], %s2983_s14, %s2983_s14, %s2965_s13  }
  0x35   : > { %s480_s19 = sshll.u32 %s2502_s17, 4  ;;  %s2685_s8 = sadd.s32 1, %s2487_s28   ;;  %s481_s19 = int_to_ptr.vmem [resolvable:$true] %s480_s19 }
  0x36   : > { %1930 = dma.hbm_to_vmem [thread:$0]  (!%p2617_p6), %s479_s1, 64, %s481_s19, [#allocation18], %s2496_s20, %s2496_s20, %s2497_s23  }
  0x37   : > { %s38_s24 = ssub.s32 %s2487_s28, %s2685_s8  ;;  %s41_s29 = sadd.s32 1, %s2483_s27 }
  0x38   : > { %p39_p7 = scmp.eq.s32.totalorder %s38_s24, 0  ;;  %p48_p8 = scmp.ne.s32.totalorder %s2483_s27, %s2479_s26 }
  0x39   : > { %p49_p9 = scmp.eq.s32.totalorder %s2487_s28, 0  ;;  %p54_p10 = scmp.ne.s32.totalorder %s2479_s26, %s2475_s25 }
  0x3a   : > { %s2696_s10 = scalar_select %p39_p7, %s2483_s27, %s41_s29  }
  0x3b   : > { %p2698_p11 = por %p49_p9, %p48_p8  ;;  %p2704_p12 = por %p55_p1, %p54_p10 }
  0x3c   : > { %p330_p13 = scmp.eq.s32.totalorder %s2600_s15, 1  ;;  %p336_p0 = scmp.eq.s32.totalorder %s1685_s21, 1 }
  0x3d   : > { %p1949_p2 = scmp.lt.s32.totalorder %s2487_s28, 2  ;;  %s494_s23 = sand.u32 1, %s2483_s27  }
  0x3e   : > { %p2711_p4 = por %p330_p13, %p48_p8  ;;  %p2715_p6 = por %p336_p0, %p54_p10 }
  0x3f   : > { %s1698_s1 = sshll.u32 %s494_s23, 3  ;;  %s1833_s5 = sshll.u32 %s2487_s28, 3 }
  0x40   : > { %s503_s19 = scalar_lea.hbm %s2946_s0, %s1833_s5  ;;  %s498_s24 = scalar_lea.vmem [#allocation2], %s1698_s1 }
  0x41   : > { %s506_s29 = sshll.u32 %s498_s24, 4  ;;  %s504_s13 = sshll.u32 %s503_s19, 4  ;;  %s507_s29 = int_to_ptr.vmem [resolvable:$true] %s506_s29  ;;  %s505_s13 = int_to_ptr.hbm [resolvable:$true] %s504_s13 }
  0x42   : > { %p2725_p7 = pnand %p1949_p2, %p2698_p11  ;;  %s495_s2 = scalar_lea.sflag [#allocation3], %s494_s23 }
  0x43   : > { %s2371_s4 = sshra.s32 %s505_s13, 4  ;;  %s2378_s18 = scalar_lea.hbm %s2946_s0, 16  ;;  %s2372_s4 = int_to_ptr.hbm [resolvable:$true] %s2371_s4 }
  0x44   : > { %s2373_s6 = scalar_lea.hbm %s2372_s4, 8  ;;  %p2375_p9 = pneg %p2725_p7 }
  0x45   : > { %p2374_p8 = scmp.ne.s32.totalorder %s2372_s4, %s2373_s6  ;;  %p2379_p11 = scmp.lt.s32.totalorder %s2372_s4, %s2946_s0 }
  0x46   : > { %p2380_p0 = scmp.lt.s32.totalorder %s2378_s18, %s2373_s6 }
  0x47   : > { %p2376_p10 = pnand %p2375_p9, %p2374_p8 }
  0x48   : > { %p2381_p2 = por %p2380_p0, %p2379_p11 }
  0x49   : > { %p2377_p13 = pneg %p2376_p10 }
  0x4b   : > { %p2382_p5 = pnand %p2381_p2, %p2377_p13 }
  0x4d   : > { %2385 = shalt.err (!%p2382_p5)
}
  0x4e   : > { %s2989_s23 = smov 4   ;;  %518 = sbr.rel (%p2605_p3) target bundleno = 4942 (0x134e), region = 72 }
  0x4f   : > { %1934 = dma.hbm_to_vmem [thread:$0]  (!%p2725_p7), %s505_s13, 128, %s507_s29, %s495_s2, %s2983_s14, %s2983_s14, %s2989_s23  }
  0x50   : > { %s2745_s19 = sand.u32 (!%p2605_p3), 1, %s2479_s26  }
  0x51   : > { %s1702_s4 = sshll.u32 (!%p2605_p3), %s2745_s19, 3  ;;  %s521_s6 = scalar_lea.sflag (!%p2605_p3), [#allocation3], %s2745_s19 }
  0x52   : > { %s524_s24 = scalar_lea.vmem (!%p2605_p3), [#allocation2], %s1702_s4 }
  0x53   : > { %2446 = dma.done.wait (%p2704_p12), %s521_s6, 128  }
  0x54   : > { %2448 = vsyncadd (%p2704_p12), %s521_s6, 4294967168 }
  0x55   : > { %2450 = dma.done.wait (%p55_p1), [#allocation6], 272  }
  0x56   : > { %2452 = vsyncadd (%p55_p1), [#allocation6], 4294967024 }
  0x57   : > { %2454 = dma.done.wait (%p55_p1), [#allocation9], 272  }
  0x58   : > { %2456 = vsyncadd (%p55_p1), [#allocation9], 4294967024 }
  0x59   : > { %2458 = dma.done.wait (%p55_p1), [#allocation12], 32  }
  0x5a   : > { %2460 = vsyncadd (%p55_p1), [#allocation12], 4294967264 }
  0x5b   : > { %2462 = dma.done.wait (%p55_p1), [#allocation15], 2048  }
  0x5c   : > { %2464 = vsyncadd (%p55_p1), [#allocation15], 4294965248 }
  0x5d   : > { %2466 = dma.done.wait (%p55_p1), [#allocation18], 128  }
  0x5e   : > { %2468 = vsyncadd (%p55_p1), [#allocation18], 4294967168  ;;  %v1836_v0 = vld [vmem:[#allocation5 + $0x8] sm:$0xff]  ;;  %v1835_v1 = vld [vmem:[#allocation5] sm:$0xff]  ;;  %vm642_vm0 = vcmask 261120   ;;  %s2990_s16 = sld [smem:[#allocation34_spill]] }
  0x5f   : > { %652 = vmatpush.bf16.msra.mxu0 %v1836_v0  ;;  %v1834_v2 = vld [vmem:[%s524_s24] sm:$0xff]  ;;  %v1839_v17 = vld [vmem:[#allocation14] sm:$0xff]  ;;  %v2013_v19 = vld [vmem:[#allocation11] ss:$0 sm:$0xff]  ;;  %s2503_s14 = smov 96   ;;  %vm766_vm1 = vcmask 64512  }
  0x60   : > { %v1838_v3 = vld [vmem:[#allocation10 + $0x8] sm:$0xff]  ;;  %v1837_v4 = vld [vmem:[#allocation10] sm:$0xff]  ;;  %v2011_v6 = vld [vmem:[#allocation7] ss:$0 sm:$0xff]  ;;  %vm784_vm2 = vcmask 130048   ;;  %s2991_s21 = sld [smem:[#allocation35_spill]] }
  0x61   : > { %700 = vmatpush.bf16.msra.mxu1 %v1838_v3  ;;  %v2012_v8 = vld [vmem:[#allocation8] ss:$0 sm:$0xff]  ;;  %v2014_v21 = vld [vmem:[#allocation13] ss:$0 sm:$0xff]  ;;  %s1713_s1 = sshll.u32 %s2745_s19, 6  ;;  %s2992_s22 = sld [smem:[#allocation36_spill]] }
  0x62   : > { %v1840_v16 = vld [vmem:[#allocation14 + $0x8] sm:$0xff]  ;;  %s2805_s5 = scalar_lea.vmem [#allocation20], %s1713_s1  ;;  %s1855_s1 = sshll.u32 %s2600_s15, 6 }
  0x63   : > { %653 = vmatpush.bf16.msra.mxu0 %v1835_v1  ;;  %748 = vmatpush.bf16.msra.mxu2 %v1840_v16  ;;  %v1844_v16 = vld [vmem:[#allocation14 + $0x18] sm:$0xff]  ;;  %s1514_s4 = sshll.u32 %s2805_s5, 4  ;;  %s1502_s15 = scalar_lea.sflag [#allocation4], %s2745_s19  ;;  %s1515_s4 = int_to_ptr.vmem [resolvable:$true] %s1514_s4 }
  0x64   : > { %v2015_v30 = vld [vmem:[%s2990_s16] ss:$0 sm:$0xff] }
  0x65   : > { %701 = vmatpush.bf16.msra.mxu1 %v1837_v4 }
  0x66   : > { %1726 = vmatmul.msk.bf16.vlgmr.msra.gmra.mxu0 %vm642_vm0, %v1834_v2 }
  0x67   : > { %749 = vmatpush.bf16.msra.mxu2 %v1839_v17  ;;  %v1843_v17 = vld [vmem:[#allocation14 + $0x10] sm:$0xff]  ;;  %s1513_s23 = scalar_lea.hbm %s2992_s22, %s1855_s1 }
  0x68   : > { %s1516_s6 = sshll.u32 %s1513_s23, 4  ;;  %s1517_s6 = int_to_ptr.hbm [resolvable:$true] %s1516_s6 }
  0x69   : > { %s2415_s24 = sshra.s32 %s1517_s6, 4  ;;  %s2416_s24 = int_to_ptr.hbm [resolvable:$true] %s2415_s24 }
  0x6a   : > { %s2417_s2 = scalar_lea.hbm %s2416_s24, 64  ;;  %p2422_p12 = scmp.lt.s32.totalorder %s2416_s24, %s2992_s22 }
  0x6b   : > { %940 = vmatpush.bf16.msrb.mxu2 %v1844_v16  ;;  %p2418_p1 = scmp.ne.s32.totalorder %s2416_s24, %s2417_s2 }
  0x6d   : > { %p2419_p3 = pnand %p2418_p1, %p2711_p4 }
  0x6f   : > { %941 = vmatpush.bf16.msrb.mxu2 %v1843_v17  ;;  %p2420_p5 = pneg %p2419_p3 }
  0xe3   : > { %v655_v5 = vpop.f32.mrf.mxu0 }
  0xe4   : > { %v664_v7 = vmul.f32 %v2011_v6, %v655_v5 }
  0xe6   : > { %v670_v10 = vadd.f32 %v2012_v8, %v664_v7 }
  0xe8   : > { %v672_v13 = vmax.f32 %v670_v10, 0.0  ;;  %v1841_v10 = vld [vmem:[#allocation16] sm:$0xff] }
  0xeb   : > { %v657_v9 = vpop.f32.mrf.mxu0 }
  0xec   : > { %v665_v11 = vmul.f32 %v2011_v6, %v657_v9  ;;  %v1842_v9 = vld [vmem:[#allocation16 + $0x8] sm:$0xff] }
  0xed   : > { %887 = vmatpush.bf16.msrb.mxu1 %v1842_v9 }
  0xee   : > { %v671_v12 = vadd.f32 %v2012_v8, %v665_v11 }
  0xf0   : > { %v673_v14 = vmax.f32 %v671_v12, 0.0 }
  0xf1   : > { %888 = vmatpush.bf16.msrb.mxu1 %v1841_v10 }
  0xf2   : > { %v674_v15 = vpack.c.bf16 %v673_v14, %v672_v13 }
  0xf4   : > { %1735 = vmatmul.msk.bf16.vlgmr.msra.gmra.mxu1 %vm642_vm0, %v674_v15 }
 0x171   : > { %v703_v18 = vpop.f32.mrf.mxu1 }
 0x172   : > { %v712_v20 = vmul.f32 %v2013_v19, %v703_v18  ;;  %v2016_v18 = vld [vmem:[%s2991_s21] ss:$0 sm:$0xff] }
 0x174   : > { %v718_v23 = vadd.f32 %v2014_v21, %v712_v20 }
 0x176   : > { %v2775_v26 = vmax.f32 %v718_v23, 0.0 }
 0x179   : > { %v705_v22 = vpop.f32.mrf.mxu1 }
 0x17a   : > { %v713_v24 = vmul.f32 %v2013_v19, %v705_v22  ;;  %v2017_v19 = vld [vmem:[#allocation17] ss:$0 sm:$0xff]  ;;  %v2018_v22 = vld [vmem:[#allocation19] ss:$0 sm:$0xff] }
 0x17c   : > { %v719_v25 = vadd.f32 %v2014_v21, %v713_v24 }
 0x17e   : > { %v2777_v27 = vmax.f32 %v719_v25, 0.0 }
 0x180   : > { %v722_v28 = vpack.c.bf16 %v2777_v27, %v2775_v26 }
 0x182   : > { %1744 = vmatmul.msk.bf16.vlgmr.msra.gmra.mxu2 %vm642_vm0, %v722_v28 }
 0x205   : > { %v751_v29 = vpop.f32.mrf.mxu2 }
 0x206   : > { %v760_v32 = vadd.f32 %v2015_v30, %v751_v29 }
 0x20d   : > { %v753_v31 = vpop.f32.mrf.mxu2 }
 0x20e   : > { %v761_v33 = vadd.f32 %v2015_v30, %v753_v31  ;;  %v762_v34 = vpack.c.bf16 %v753_v31, %v751_v29 }
 0x210   : > { %764 = vrot.lane.b32.xlu0 %v762_v34, %s2503_s14  ;;  %v821_v35 = vpack.c.bf16 %v761_v33, %v760_v32 }
 0x212   : > { %848 = vmatpush.bf16.msrb.mxu0 %v821_v35 }
 0x282   : > { %v765_v36 = vpop.permute.xlu0 %764 }
 0x283   : > { %v768_v37 = vsel %vm766_vm1, %v765_v36, 0 }
 0x284   : > { %777 = vmatpush.bf16.xpose.msra.mxu3 %v768_v37 }
 0x28b   : > { %1745 = vmatmul.msk.bf16.vlgmr.msra.gmra.mxu3 %vm766_vm1, %v765_v36  ;;  %v2019_v36 = vld [vmem:[%s2990_s16 + $0x1] ss:$0 sm:$0xff] }
 0x30e   : > { %v779_v38 = vpop.f32.mrf.mxu3 }
 0x30f   : > { %v785_v39 = vsel %vm784_vm2, %v779_v38, -inf }
 0x310   : > { %786 = vmax.xlane.f32.xlu0 %v785_v39 }
 0x316   : > { %v781_v40 = vpop.f32.mrf.mxu3 }
 0x317   : > { %v788_v41 = vsel %vm784_vm2, %v781_v40, -inf }
 0x318   : > { %789 = vmax.xlane.f32.xlu1 %v788_v41 }
 0x383   : > { %v787_v42 = vpop.xlane.xlu0 %786 }
 0x384   : > { %v791_v43 = vsub.f32 %v779_v38, %v787_v42 }
 0x386   : > { %v793_v44 = vmul.f32 1.442695, %v791_v43 }
 0x388   : > { %2031 = vpow2.f32 %v793_v44 }
 0x38b   : > { %v790_v45 = vpop.xlane.xlu1 %789 }
 0x38c   : > { %v792_v46 = vsub.f32 %v781_v40, %v790_v45 }
 0x38e   : > { %v2032_v47 = vpop.eup %2031  ;;  %v795_v48 = vmul.f32 1.442695, %v792_v46 }
 0x38f   : > { %v797_v49 = vsel %vm784_vm2, %v2032_v47, 0.0 }
 0x390   : > { %2033 = vpow2.f32 %v795_v48  ;;  %798 = vadd.xlane.f32.xlu1 %v797_v49 }
 0x396   : > { %v2034_v50 = vpop.eup %2033 }
 0x397   : > { %v800_v51 = vsel %vm784_vm2, %v2034_v50, 0.0 }
 0x398   : > { %801 = vadd.xlane.f32.xlu2 %v800_v51 }
 0x403   : > { %v799_v52 = vpop.xlane.xlu1 %798 }
 0x404   : > { %2035 = vrcp.f32 %v799_v52 }
 0x40a   : > { %v2036_v54 = vpop.eup %2035 }
 0x40b   : > { %v802_v53 = vpop.xlane.xlu2 %801  ;;  %v805_v55 = vmul.f32 %v2036_v54, %v2032_v47 }
 0x40c   : > { %2037 = vrcp.f32 %v802_v53 }
 0x40d   : > { %v807_v58 = vsel %vm784_vm2, %v805_v55, 0.0 }
 0x412   : > { %v2038_v56 = vpop.eup %2037 }
 0x413   : > { %v806_v57 = vmul.f32 %v2038_v56, %v2034_v50 }
 0x415   : > { %v808_v59 = vsel %vm784_vm2, %v806_v57, 0.0 }
 0x416   : > { %v809_v60 = vadd.f32 %v808_v59, %v807_v58 }
 0x418   : > { %v810_v61 = vrot.slane %v809_v60, 4 }
 0x41a   : > { %v811_v62 = vadd.f32 %v810_v61, %v809_v60 }
 0x41c   : > { %v812_v63 = vrot.slane %v811_v62, 2 }
 0x41e   : > { %v813_v0 = vadd.f32 %v812_v63, %v811_v62 }
 0x420   : > { %v814_v1 = vrot.slane %v813_v0, 1 }
 0x422   : > { %v815_v2 = vadd.f32 %v814_v1, %v813_v0 }
 0x424   : > { %v816_v3 = vadd.f32 1e-09, %v815_v2 }
 0x426   : > { %2039 = vrcp.f32 %v816_v3 }
 0x42c   : > { %v2040_v4 = vpop.eup %2039 }
 0x42d   : > { %v818_v5 = vmul.f32 %v2040_v4, %v805_v55  ;;  %v819_v6 = vmul.f32 %v2040_v4, %v806_v57 }
 0x42f   : > { %v820_v7 = vpack.c.bf16 %v819_v6, %v818_v5 }
 0x431   : > { %822 = vxpose.xlu2.c.b16.start.end [1/1] (short) (narrow) %v820_v7, 16 }
 0x4d2   : > { %v830_v8 = vpop.trf.xlu2 }
 0x4d3   : > { %1746 = vmatmul.msk.bf16.vlgmr.msrb.gmra.mxu0 %vm784_vm2, %v830_v8 }
 0x550   : > { %v850_v11 = vpop.f32.mrf.mxu0 }
 0x551   : > { %v855_v13 = vsub.f32 %v2775_v26, %v850_v11 }
 0x558   : > { %v852_v12 = vpop.f32.mrf.mxu0 }
 0x559   : > { %v856_v14 = vsub.f32 %v2777_v27, %v852_v12 }
 0x55b   : > { %v857_v15 = vpack.c.bf16 %v856_v14, %v855_v13  ;;  %v1846_v14 = vld [vmem:[#allocation16 + $0x18] sm:$0xff] }
 0x55c   : > { %1080 = vmatpush.bf16.msra.mxu1 %v1846_v14 }
 0x55d   : > { %1755 = vmatmul.msk.bf16.vlgmr.msrb.gmra.mxu1 %vm642_vm0, %v857_v15  ;;  %v1845_v15 = vld [vmem:[#allocation16 + $0x10] sm:$0xff] }
 0x560   : > { %1081 = vmatpush.bf16.msra.mxu1 %v1845_v15 }
 0x5da   : > { %v890_v20 = vpop.f32.mrf.mxu1 }
 0x5db   : > { %v891_v21 = vadd.f32 %v2016_v18, %v890_v20 }
 0x5dd   : > { %v899_v23 = vmul.f32 %v2017_v19, %v891_v21  ;;  %v1848_v21 = vld [vmem:[#allocation14 + $0x28] sm:$0xff] }
 0x5de   : > { %1136 = vmatpush.bf16.msra.mxu2 %v1848_v21 }
 0x5df   : > { %v905_v24 = vadd.f32 %v2018_v22, %v899_v23  ;;  %v2020_v23 = vld [vmem:[%s2991_s21 + $0x1] ss:$0 sm:$0xff] }
 0x5e1   : > { %v907_v25 = vmax.f32 %v905_v24, 0.0  ;;  %v2021_v24 = vld [vmem:[#allocation17 + $0x1] ss:$0 sm:$0xff] }
 0x5e2   : > { %v892_v28 = vpop.f32.mrf.mxu1 }
 0x5e3   : > { %v2803_v29 = vadd.f32 %v907_v25, %v2775_v26  ;;  %v893_v30 = vadd.f32 %v2016_v18, %v892_v28 }
 0x5e5   : > { %911 = vst.msk [vmem:[%s2805_s5] sm:$0xff] %vm642_vm0, %v2803_v29  ;;  %v900_v31 = vmul.f32 %v2017_v19, %v893_v30  ;;  %v2022_v30 = vld [vmem:[#allocation19 + $0x1] ss:$0 sm:$0xff] }
 0x5e7   : > { %v906_v32 = vadd.f32 %v2018_v22, %v900_v31  ;;  %v1847_v22 = vld [vmem:[#allocation14 + $0x20] sm:$0xff] }
 0x5e8   : > { %1137 = vmatpush.bf16.msra.mxu2 %v1847_v22 }
 0x5e9   : > { %v908_v33 = vmax.f32 %v906_v32, 0.0 }
 0x5eb   : > { %v2811_v34 = vadd.f32 %v908_v33, %v2777_v27 }
 0x5ed   : > { %912 = vst.msk [vmem:[%s2805_s5 + $0x8] sm:$0xff] %vm642_vm0, %v2811_v34  ;;  %v913_v26 = vpack.c.bf16 %v2811_v34, %v2803_v29 }
 0x5ef   : > { %1764 = vmatmul.msk.bf16.vlgmr.msrb.gmra.mxu2 %vm642_vm0, %v913_v26 }
 0x672   : > { %v943_v35 = vpop.f32.mrf.mxu2 }
 0x673   : > { %v953_v38 = vadd.f32 %v2019_v36, %v943_v35 }
 0x67a   : > { %v945_v37 = vpop.f32.mrf.mxu2 }
 0x67b   : > { %v954_v39 = vadd.f32 %v2019_v36, %v945_v37  ;;  %v955_v40 = vpack.c.bf16 %v945_v37, %v943_v35 }
 0x67d   : > { %v1012_v41 = vpack.c.bf16 %v954_v39, %v953_v38  ;;  %957 = vrot.lane.b32.xlu1 %v955_v40, %s2503_s14 }
 0x67f   : > { %1039 = vmatpush.bf16.msra.mxu0 %v1012_v41 }
 0x6ef   : > { %v958_v27 = vpop.permute.xlu1 %957 }
 0x6f0   : > { %v960_v42 = vsel %vm766_vm1, %v958_v27, 0 }
 0x6f1   : > { %969 = vmatpush.bf16.xpose.msrb.mxu3 %v960_v42 }
 0x6f8   : > { %1766 = vmatmul.msk.bf16.vlgmr.msrb.gmra.mxu3 %vm766_vm1, %v958_v27  ;;  %v2023_v27 = vld [vmem:[%s2990_s16 + $0x2] ss:$0 sm:$0xff] }
 0x77b   : > { %v971_v43 = vpop.f32.mrf.mxu3 }
 0x77c   : > { %v976_v44 = vsel %vm784_vm2, %v971_v43, -inf }
 0x77d   : > { %977 = vmax.xlane.f32.xlu1 %v976_v44 }
 0x783   : > { %v973_v45 = vpop.f32.mrf.mxu3 }
 0x784   : > { %v979_v46 = vsel %vm784_vm2, %v973_v45, -inf }
 0x785   : > { %980 = vmax.xlane.f32.xlu2 %v979_v46 }
 0x7f0   : > { %v978_v47 = vpop.xlane.xlu1 %977 }
 0x7f1   : > { %v982_v48 = vsub.f32 %v971_v43, %v978_v47 }
 0x7f3   : > { %v984_v49 = vmul.f32 1.442695, %v982_v48 }
 0x7f5   : > { %2041 = vpow2.f32 %v984_v49 }
 0x7f8   : > { %v981_v50 = vpop.xlane.xlu2 %980 }
 0x7f9   : > { %v983_v51 = vsub.f32 %v973_v45, %v981_v50 }
 0x7fb   : > { %v2042_v52 = vpop.eup %2041  ;;  %v986_v53 = vmul.f32 1.442695, %v983_v51 }
 0x7fc   : > { %v988_v54 = vsel %vm784_vm2, %v2042_v52, 0.0 }
 0x7fd   : > { %2043 = vpow2.f32 %v986_v53  ;;  %989 = vadd.xlane.f32.xlu0 %v988_v54 }
 0x803   : > { %v2044_v55 = vpop.eup %2043 }
 0x804   : > { %v991_v56 = vsel %vm784_vm2, %v2044_v55, 0.0 }
 0x805   : > { %992 = vadd.xlane.f32.xlu0 %v991_v56 }
 0x870   : > { %v990_v57 = vpop.xlane.xlu0 %989 }
 0x871   : > { %2045 = vrcp.f32 %v990_v57 }
 0x877   : > { %v2046_v59 = vpop.eup %2045 }
 0x878   : > { %v993_v58 = vpop.xlane.xlu0 %992  ;;  %v996_v60 = vmul.f32 %v2046_v59, %v2042_v52 }
 0x879   : > { %2047 = vrcp.f32 %v993_v58 }
 0x87a   : > { %v998_v63 = vsel %vm784_vm2, %v996_v60, 0.0 }
 0x87f   : > { %v2048_v61 = vpop.eup %2047 }
 0x880   : > { %v997_v62 = vmul.f32 %v2048_v61, %v2044_v55 }
 0x882   : > { %v999_v0 = vsel %vm784_vm2, %v997_v62, 0.0 }
 0x883   : > { %v1000_v1 = vadd.f32 %v999_v0, %v998_v63 }
 0x885   : > { %v1001_v2 = vrot.slane %v1000_v1, 4 }
 0x887   : > { %v1002_v3 = vadd.f32 %v1001_v2, %v1000_v1 }
 0x889   : > { %v1003_v4 = vrot.slane %v1002_v3, 2 }
 0x88b   : > { %v1004_v5 = vadd.f32 %v1003_v4, %v1002_v3 }
 0x88d   : > { %v1005_v6 = vrot.slane %v1004_v5, 1 }
 0x88f   : > { %v1006_v7 = vadd.f32 %v1005_v6, %v1004_v5 }
 0x891   : > { %v1007_v8 = vadd.f32 1e-09, %v1006_v7 }
 0x893   : > { %2049 = vrcp.f32 %v1007_v8 }
 0x899   : > { %v2050_v9 = vpop.eup %2049 }
 0x89a   : > { %v1009_v10 = vmul.f32 %v2050_v9, %v996_v60  ;;  %v1010_v11 = vmul.f32 %v2050_v9, %v997_v62 }
 0x89c   : > { %v1011_v12 = vpack.c.bf16 %v1010_v11, %v1009_v10 }
 0x89e   : > { %1013 = vxpose.xlu0.c.b16.start.end [1/1] (short) (narrow) %v1011_v12, 16 }
 0x94a   : > { %v1021_v13 = vpop.trf.xlu0 }
 0x94b   : > { %1767 = vmatmul.msk.bf16.vlgmr.msra.gmra.mxu0 %vm784_vm2, %v1021_v13 }
 0x9c8   : > { %v1041_v16 = vpop.f32.mrf.mxu0 }
 0x9c9   : > { %v1046_v18 = vsub.f32 %v2803_v29, %v1041_v16 }
 0x9d0   : > { %v1043_v17 = vpop.f32.mrf.mxu0 }
 0x9d1   : > { %v1047_v19 = vsub.f32 %v2811_v34, %v1043_v17 }
 0x9d3   : > { %v1048_v20 = vpack.c.bf16 %v1047_v19, %v1046_v18  ;;  %v1850_v19 = vld [vmem:[#allocation16 + $0x28] sm:$0xff] }
 0x9d4   : > { %1276 = vmatpush.bf16.msrb.mxu1 %v1850_v19 }
 0x9d5   : > { %1777 = vmatmul.msk.bf16.vlgmr.msra.gmra.mxu1 %vm642_vm0, %v1048_v20  ;;  %v1849_v20 = vld [vmem:[#allocation16 + $0x20] sm:$0xff] }
 0x9d8   : > { %1277 = vmatpush.bf16.msrb.mxu1 %v1849_v20 }
 0xa52   : > { %v1083_v25 = vpop.f32.mrf.mxu1 }
 0xa53   : > { %v1084_v28 = vadd.f32 %v2020_v23, %v1083_v25 }
 0xa55   : > { %v1093_v31 = vmul.f32 %v2021_v24, %v1084_v28  ;;  %v1852_v28 = vld [vmem:[#allocation14 + $0x38] sm:$0xff] }
 0xa56   : > { %1332 = vmatpush.bf16.msrb.mxu2 %v1852_v28 }
 0xa57   : > { %v1100_v32 = vadd.f32 %v2022_v30, %v1093_v31  ;;  %v2024_v31 = vld [vmem:[%s2991_s21 + $0x2] ss:$0 sm:$0xff] }
 0xa59   : > { %v1102_v33 = vmax.f32 %v1100_v32, 0.0  ;;  %v2025_v32 = vld [vmem:[#allocation17 + $0x2] ss:$0 sm:$0xff] }
 0xa5a   : > { %v1085_v26 = vpop.f32.mrf.mxu1 }
 0xa5b   : > { %v2839_v35 = vadd.f32 %v1102_v33, %v2803_v29  ;;  %v1086_v36 = vadd.f32 %v2020_v23, %v1085_v26 }
 0xa5d   : > { %1778 = vst.msk [vmem:[%s2805_s5 + $0x10] sm:$0xff] %vm642_vm0, %v2839_v35  ;;  %v1094_v37 = vmul.f32 %v2021_v24, %v1086_v36  ;;  %v2026_v36 = vld [vmem:[#allocation19 + $0x2] ss:$0 sm:$0xff] }
 0xa5f   : > { %v1101_v38 = vadd.f32 %v2022_v30, %v1094_v37  ;;  %v1851_v30 = vld [vmem:[#allocation14 + $0x30] sm:$0xff] }
 0xa60   : > { %1333 = vmatpush.bf16.msrb.mxu2 %v1851_v30 }
 0xa61   : > { %v1103_v39 = vmax.f32 %v1101_v38, 0.0 }
 0xa63   : > { %v2845_v40 = vadd.f32 %v1103_v39, %v2811_v34 }
 0xa65   : > { %1779 = vst.msk [vmem:[%s2805_s5 + $0x18] sm:$0xff] %vm642_vm0, %v2845_v40  ;;  %v1109_v41 = vpack.c.bf16 %v2845_v40, %v2839_v35 }
 0xa67   : > { %1788 = vmatmul.msk.bf16.vlgmr.msra.gmra.mxu2 %vm642_vm0, %v1109_v41 }
 0xaea   : > { %v1139_v29 = vpop.f32.mrf.mxu2 }
 0xaeb   : > { %v1149_v43 = vadd.f32 %v2023_v27, %v1139_v29 }
 0xaf2   : > { %v1141_v42 = vpop.f32.mrf.mxu2 }
 0xaf3   : > { %v1150_v44 = vadd.f32 %v2023_v27, %v1141_v42  ;;  %v1151_v45 = vpack.c.bf16 %v1141_v42, %v1139_v29 }
 0xaf5   : > { %v1208_v46 = vpack.c.bf16 %v1150_v44, %v1149_v43  ;;  %1153 = vrot.lane.b32.xlu1 %v1151_v45, %s2503_s14 }
 0xaf7   : > { %1235 = vmatpush.bf16.msrb.mxu0 %v1208_v46 }
 0xb67   : > { %v1154_v34 = vpop.permute.xlu1 %1153 }
 0xb68   : > { %v1156_v47 = vsel %vm766_vm1, %v1154_v34, 0 }
 0xb69   : > { %1165 = vmatpush.bf16.xpose.msra.mxu3 %v1156_v47 }
 0xb70   : > { %1790 = vmatmul.msk.bf16.vlgmr.msra.gmra.mxu3 %vm766_vm1, %v1154_v34  ;;  %v2027_v34 = vld [vmem:[%s2990_s16 + $0x3] ss:$0 sm:$0xff] }
 0xbf3   : > { %v1167_v48 = vpop.f32.mrf.mxu3 }
 0xbf4   : > { %v1172_v49 = vsel %vm784_vm2, %v1167_v48, -inf }
 0xbf5   : > { %1173 = vmax.xlane.f32.xlu0 %v1172_v49 }
 0xbfb   : > { %v1169_v50 = vpop.f32.mrf.mxu3 }
 0xbfc   : > { %v1175_v51 = vsel %vm784_vm2, %v1169_v50, -inf }
 0xbfd   : > { %1176 = vmax.xlane.f32.xlu1 %v1175_v51 }
 0xc68   : > { %v1174_v52 = vpop.xlane.xlu0 %1173 }
 0xc69   : > { %v1178_v53 = vsub.f32 %v1167_v48, %v1174_v52 }
 0xc6b   : > { %v1180_v54 = vmul.f32 1.442695, %v1178_v53 }
 0xc6d   : > { %2051 = vpow2.f32 %v1180_v54 }
 0xc70   : > { %v1177_v55 = vpop.xlane.xlu1 %1176 }
 0xc71   : > { %v1179_v56 = vsub.f32 %v1169_v50, %v1177_v55 }
 0xc73   : > { %v2052_v57 = vpop.eup %2051  ;;  %v1182_v58 = vmul.f32 1.442695, %v1179_v56 }
 0xc74   : > { %v1184_v59 = vsel %vm784_vm2, %v2052_v57, 0.0 }
 0xc75   : > { %2053 = vpow2.f32 %v1182_v58  ;;  %1185 = vadd.xlane.f32.xlu1 %v1184_v59 }
 0xc7b   : > { %v2054_v60 = vpop.eup %2053 }
 0xc7c   : > { %v1187_v61 = vsel %vm784_vm2, %v2054_v60, 0.0 }
 0xc7d   : > { %1188 = vadd.xlane.f32.xlu1 %v1187_v61 }
 0xce8   : > { %v1186_v62 = vpop.xlane.xlu1 %1185 }
 0xce9   : > { %2055 = vrcp.f32 %v1186_v62 }
 0xcef   : > { %v2056_v0 = vpop.eup %2055 }
 0xcf0   : > { %v1189_v63 = vpop.xlane.xlu1 %1188  ;;  %v1192_v1 = vmul.f32 %v2056_v0, %v2052_v57 }
 0xcf1   : > { %2057 = vrcp.f32 %v1189_v63 }
 0xcf2   : > { %v1194_v4 = vsel %vm784_vm2, %v1192_v1, 0.0 }
 0xcf7   : > { %v2058_v2 = vpop.eup %2057 }
 0xcf8   : > { %v1193_v3 = vmul.f32 %v2058_v2, %v2054_v60 }
 0xcfa   : > { %v1195_v5 = vsel %vm784_vm2, %v1193_v3, 0.0 }
 0xcfb   : > { %v1196_v6 = vadd.f32 %v1195_v5, %v1194_v4 }
 0xcfd   : > { %v1197_v7 = vrot.slane %v1196_v6, 4 }
 0xcff   : > { %v1198_v8 = vadd.f32 %v1197_v7, %v1196_v6 }
 0xd01   : > { %v1199_v9 = vrot.slane %v1198_v8, 2 }
 0xd03   : > { %v1200_v10 = vadd.f32 %v1199_v9, %v1198_v8 }
 0xd05   : > { %v1201_v11 = vrot.slane %v1200_v10, 1 }
 0xd07   : > { %v1202_v12 = vadd.f32 %v1201_v11, %v1200_v10 }
 0xd09   : > { %v1203_v13 = vadd.f32 1e-09, %v1202_v12 }
 0xd0b   : > { %2059 = vrcp.f32 %v1203_v13 }
 0xd11   : > { %v2060_v14 = vpop.eup %2059 }
 0xd12   : > { %v1205_v15 = vmul.f32 %v2060_v14, %v1192_v1  ;;  %v1206_v16 = vmul.f32 %v2060_v14, %v1193_v3 }
 0xd14   : > { %v1207_v17 = vpack.c.bf16 %v1206_v16, %v1205_v15 }
 0xd16   : > { %1209 = vxpose.xlu2.c.b16.start.end [1/1] (short) (narrow) %v1207_v17, 16 }
 0xdb7   : > { %v1217_v18 = vpop.trf.xlu2 }
 0xdb8   : > { %1791 = vmatmul.msk.bf16.vlgmr.msrb.gmra.mxu0 %vm784_vm2, %v1217_v18 }
 0xe35   : > { %v1237_v21 = vpop.f32.mrf.mxu0 }
 0xe36   : > { %v1242_v23 = vsub.f32 %v2839_v35, %v1237_v21 }
 0xe3d   : > { %v1239_v22 = vpop.f32.mrf.mxu0 }
 0xe3e   : > { %v1243_v24 = vsub.f32 %v2845_v40, %v1239_v22 }
 0xe40   : > { %v1244_v25 = vpack.c.bf16 %v1243_v24, %v1242_v23  ;;  %v1854_v24 = vld [vmem:[#allocation16 + $0x38] sm:$0xff] }
 0xe41   : > { %1472 = vmatpush.bf16.msra.mxu1 %v1854_v24 }
 0xe42   : > { %1801 = vmatmul.msk.bf16.vlgmr.msrb.gmra.mxu1 %vm642_vm0, %v1244_v25  ;;  %v1853_v25 = vld [vmem:[#allocation16 + $0x30] sm:$0xff] }
 0xe45   : > { %1473 = vmatpush.bf16.msra.mxu1 %v1853_v25 }
 0xebf   : > { %v1279_v33 = vpop.f32.mrf.mxu1 }
 0xec0   : > { %v1280_v26 = vadd.f32 %v2024_v31, %v1279_v33 }
 0xec2   : > { %v1289_v37 = vmul.f32 %v2025_v32, %v1280_v26  ;;  %v2028_v26 = vld [vmem:[%s2991_s21 + $0x3] ss:$0 sm:$0xff] }
 0xec4   : > { %v1296_v38 = vadd.f32 %v2026_v36, %v1289_v37 }
 0xec6   : > { %v1298_v39 = vmax.f32 %v1296_v38, 0.0 }
 0xec7   : > { %v1281_v41 = vpop.f32.mrf.mxu1 }
 0xec8   : > { %v2873_v29 = vadd.f32 %v1298_v39, %v2839_v35  ;;  %v1282_v27 = vadd.f32 %v2024_v31, %v1281_v41  ;;  %v2030_v39 = vld [vmem:[#allocation19 + $0x3] ss:$0 sm:$0xff] }
 0xeca   : > { %1802 = vst.msk [vmem:[%s2805_s5 + $0x20] sm:$0xff] %vm642_vm0, %v2873_v29  ;;  %v1290_v42 = vmul.f32 %v2025_v32, %v1282_v27 }
 0xecc   : > { %v1297_v43 = vadd.f32 %v2026_v36, %v1290_v42  ;;  %v2029_v36 = vld [vmem:[#allocation17 + $0x3] ss:$0 sm:$0xff] }
 0xece   : > { %v1299_v44 = vmax.f32 %v1297_v43, 0.0 }
 0xed0   : > { %v2879_v45 = vadd.f32 %v1299_v44, %v2845_v40 }
 0xed2   : > { %1803 = vst.msk [vmem:[%s2805_s5 + $0x28] sm:$0xff] %vm642_vm0, %v2879_v45  ;;  %v1305_v46 = vpack.c.bf16 %v2879_v45, %v2873_v29 }
 0xed4   : > { %1812 = vmatmul.msk.bf16.vlgmr.msrb.gmra.mxu2 %vm642_vm0, %v1305_v46 }
 0xf57   : > { %v1335_v35 = vpop.f32.mrf.mxu2 }
 0xf58   : > { %v1345_v48 = vadd.f32 %v2027_v34, %v1335_v35 }
 0xf5f   : > { %v1337_v47 = vpop.f32.mrf.mxu2 }
 0xf60   : > { %v1346_v49 = vadd.f32 %v2027_v34, %v1337_v47  ;;  %v1347_v50 = vpack.c.bf16 %v1337_v47, %v1335_v35 }
 0xf62   : > { %v1404_v51 = vpack.c.bf16 %v1346_v49, %v1345_v48  ;;  %1349 = vrot.lane.b32.xlu1 %v1347_v50, %s2503_s14  ;;  %s2421_s14 = scalar_lea.hbm %s2992_s22, 128 }
 0xf63   : > { %p2423_p7 = scmp.lt.s32.totalorder %s2421_s14, %s2417_s2 }
 0xf64   : > { %1431 = vmatpush.bf16.msra.mxu0 %v1404_v51 }
 0xf65   : > { %p2424_p8 = por %p2423_p7, %p2422_p12 }
 0xf67   : > { %p2425_p9 = pnand %p2424_p8, %p2420_p5 }
 0xfd4   : > { %v1350_v40 = vpop.permute.xlu1 %1349 }
 0xfd5   : > { %v1352_v52 = vsel %vm766_vm1, %v1350_v40, 0 }
 0xfd6   : > { %1361 = vmatpush.bf16.xpose.msrb.mxu3 %v1352_v52 }
 0xfdd   : > { %1814 = vmatmul.msk.bf16.vlgmr.msrb.gmra.mxu3 %vm766_vm1, %v1350_v40 }
0x1060   : > { %v1363_v53 = vpop.f32.mrf.mxu3 }
0x1061   : > { %v1368_v54 = vsel %vm784_vm2, %v1363_v53, -inf }
0x1062   : > { %1369 = vmax.xlane.f32.xlu1 %v1368_v54 }
0x1068   : > { %v1365_v55 = vpop.f32.mrf.mxu3 }
0x1069   : > { %v1371_v56 = vsel %vm784_vm2, %v1365_v55, -inf }
0x106a   : > { %1372 = vmax.xlane.f32.xlu2 %v1371_v56 }
0x10d5   : > { %v1370_v57 = vpop.xlane.xlu1 %1369 }
0x10d6   : > { %v1374_v58 = vsub.f32 %v1363_v53, %v1370_v57 }
0x10d8   : > { %v1376_v59 = vmul.f32 1.442695, %v1374_v58 }
0x10da   : > { %2061 = vpow2.f32 %v1376_v59 }
0x10dd   : > { %v1373_v60 = vpop.xlane.xlu2 %1372 }
0x10de   : > { %v1375_v61 = vsub.f32 %v1365_v55, %v1373_v60 }
0x10e0   : > { %v2062_v62 = vpop.eup %2061  ;;  %v1378_v63 = vmul.f32 1.442695, %v1375_v61 }
0x10e1   : > { %v1380_v0 = vsel %vm784_vm2, %v2062_v62, 0.0 }
0x10e2   : > { %2063 = vpow2.f32 %v1378_v63  ;;  %1381 = vadd.xlane.f32.xlu0 %v1380_v0 }
0x10e8   : > { %v2064_v1 = vpop.eup %2063 }
0x10e9   : > { %v1383_v2 = vsel %vm784_vm2, %v2064_v1, 0.0 }
0x10ea   : > { %1384 = vadd.xlane.f32.xlu0 %v1383_v2 }
0x1155   : > { %v1382_v3 = vpop.xlane.xlu0 %1381 }
0x1156   : > { %2065 = vrcp.f32 %v1382_v3 }
0x115c   : > { %v2066_v5 = vpop.eup %2065 }
0x115d   : > { %v1385_v4 = vpop.xlane.xlu0 %1384  ;;  %v1388_v6 = vmul.f32 %v2066_v5, %v2062_v62 }
0x115e   : > { %2067 = vrcp.f32 %v1385_v4 }
0x115f   : > { %v1390_v9 = vsel %vm784_vm2, %v1388_v6, 0.0 }
0x1164   : > { %v2068_v7 = vpop.eup %2067 }
0x1165   : > { %v1389_v8 = vmul.f32 %v2068_v7, %v2064_v1 }
0x1167   : > { %v1391_v10 = vsel %vm784_vm2, %v1389_v8, 0.0 }
0x1168   : > { %v1392_v11 = vadd.f32 %v1391_v10, %v1390_v9 }
0x116a   : > { %v1393_v12 = vrot.slane %v1392_v11, 4 }
0x116c   : > { %v1394_v13 = vadd.f32 %v1393_v12, %v1392_v11 }
0x116e   : > { %v1395_v14 = vrot.slane %v1394_v13, 2 }
0x1170   : > { %v1396_v15 = vadd.f32 %v1395_v14, %v1394_v13 }
0x1172   : > { %v1397_v16 = vrot.slane %v1396_v15, 1 }
0x1174   : > { %v1398_v17 = vadd.f32 %v1397_v16, %v1396_v15 }
0x1176   : > { %v1399_v18 = vadd.f32 1e-09, %v1398_v17 }
0x1178   : > { %2069 = vrcp.f32 %v1399_v18 }
0x117e   : > { %v2070_v19 = vpop.eup %2069 }
0x117f   : > { %v1401_v20 = vmul.f32 %v2070_v19, %v1388_v6  ;;  %v1402_v21 = vmul.f32 %v2070_v19, %v1389_v8 }
0x1181   : > { %v1403_v22 = vpack.c.bf16 %v1402_v21, %v1401_v20 }
0x1183   : > { %1405 = vxpose.xlu1.c.b16.start.end [1/1] (short) (narrow) %v1403_v22, 16 }
0x122f   : > { %v1413_v23 = vpop.trf.xlu1 }
0x1230   : > { %1815 = vmatmul.msk.bf16.vlgmr.msra.gmra.mxu0 %vm784_vm2, %v1413_v23 }
0x12ad   : > { %v1433_v28 = vpop.f32.mrf.mxu0 }
0x12ae   : > { %v1438_v31 = vsub.f32 %v2873_v29, %v1433_v28 }
0x12b5   : > { %v1435_v30 = vpop.f32.mrf.mxu0 }
0x12b6   : > { %v1439_v32 = vsub.f32 %v2879_v45, %v1435_v30 }
0x12b8   : > { %v1440_v33 = vpack.c.bf16 %v1439_v32, %v1438_v31 }
0x12ba   : > { %1825 = vmatmul.msk.bf16.vlgmr.msra.gmra.mxu1 %vm642_vm0, %v1440_v33 }
0x1337   : > { %v1475_v37 = vpop.f32.mrf.mxu1 }
0x1338   : > { %v1476_v38 = vadd.f32 %v2028_v26, %v1475_v37 }
0x133a   : > { %v1485_v41 = vmul.f32 %v2029_v36, %v1476_v38 }
0x133c   : > { %v1492_v27 = vadd.f32 %v2030_v39, %v1485_v41 }
0x133e   : > { %v1494_v42 = vmax.f32 %v1492_v27, 0.0 }
0x133f   : > { %v1477_v43 = vpop.f32.mrf.mxu1 }
0x1340   : > { %v1496_v44 = vadd.f32 %v1494_v42, %v2873_v29  ;;  %v1478_v46 = vadd.f32 %v2028_v26, %v1477_v43 }
0x1342   : > { %1826 = vst.msk [vmem:[%s2805_s5 + $0x30] sm:$0xff] %vm642_vm0, %v1496_v44  ;;  %v1486_v35 = vmul.f32 %v2029_v36, %v1478_v46 }
0x1344   : > { %v1493_v34 = vadd.f32 %v2030_v39, %v1486_v35 }
0x1346   : > { %v1495_v47 = vmax.f32 %v1493_v34, 0.0 }
0x1348   : > { %v1497_v48 = vadd.f32 %v1495_v47, %v2879_v45 }
0x134a   : > { %1827 = vst.msk [vmem:[%s2805_s5 + $0x38] sm:$0xff] %vm642_vm0, %v1497_v48 }
0x134b   : > { %2428 = shalt.err (!%p2425_p9)
}
0x134c   : > { %s2504_s19 = smov 128   ;;  %s2505_s5 = smov 8  }
0x134d   : > { %1898 = dma.vmem_to_hbm [thread:$0]  (%p2711_p4), %s1515_s4, 1024, %s1517_s6, %s1502_s15, %s2504_s19, %s2504_s19, %s2505_s5  }
0x134e PF: > { %s1531_s18 = sand.u32 1, %s2475_s25   ;;  %p2993_p10 = scmp.ge.s32.totalorder %s2487_s28, 2 }
0x134f   : > { %s1532_s17 = scalar_lea.sflag [#allocation4], %s1531_s18 }
0x1350   : > { %p1936_p13 = pnand %p2993_p10, %p2715_p6 }
0x1352   : > { %p1937_p11 = pneg %p1936_p13 }
0x1354   : > { %2470 = dma.done.wait (%p1937_p11), %s1532_s17, 1024  }
0x1355   : > { %2472 = vsyncadd (%p1937_p11), %s1532_s17, 4294966272  ;;  %p31_p0 = scmp.ge.s32.totalorder %s2685_s8, 4   ;;  %s2994_s25 = smov %s2479_s26 }
0x1356   : > { %s2995_s26 = smov %s2483_s27  ;;  %s2996_s27 = smov %s2696_s10 }
0x1357   : > { %s2997_s28 = smov %s2685_s8  ;;  %33 = sbr.rel (!%p31_p0) target bundleno = 20 (0x14), region = 178 }
0x135c   :  { %1538 = vsyncpa [#allocation3], 1 }
0x135d   :  { %1540 = vsyncpa [#allocation3 + $0x1], 1 }
0x135e   :  { %1541 = vsyncpa [#allocation6], 1 }
0x135f   :  { %1542 = vsyncpa [#allocation9], 1 }
0x1360   :  { %1543 = vsyncpa [#allocation12], 1 }
0x1361   :  { %1544 = vsyncpa [#allocation15], 1 }
0x1362   :  { %1545 = vsyncpa [#allocation18], 1 }
0x1363   :  { %1546 = vsyncpa [#allocation4], 1 }
0x1364   :  { %1548 = vsyncpa [#allocation4 + $0x1], 1 }

</bundles_post_ra>
